<compile_context>
chip_gen: v5e
topology: v5e:2x2
jax: 0.10.0
libtpu: 0.0.40
codegen_flags: <defaults>
</compile_context>

<pallas_src>
import functools

import jax
import jax.numpy as jnp
from jax import lax
from jax.experimental import pallas as pl
from jax.experimental.pallas import tpu as pltpu

NEG_SLOPE = 0.01   # F.leaky_relu default
BN_EPS = 1e-5      # nn.BatchNorm2d default


def _round_up(a, b):
    return (a + b - 1) // b * b


def _pick_tile_h(n_batch, h, w_row, c_pad):
    """Largest divisor of H whose f32 accumulator stays under ~4 MiB (v7x safe),
    while keeping >= 2 total grid tiles so both v7x TensorCores get work."""
    acc_budget = 4 * 1024 * 1024
    tile_h = 1
    for d in range(1, h + 1):
        if h % d == 0 and d * w_row * c_pad * 4 <= acc_budget:
            tile_h = d
    if n_batch * (h // tile_h) < 2:            # keep the grid >= 2 tiles (v7x)
        for d in range(tile_h - 1, 0, -1):
            if h % d == 0:
                tile_h = d
                break
    return tile_h


# ---------------------------------------------------------------------------
# Shared body: conv3x3 + bias + leaky_relu for one halo'd tile, computed as
# 3 row(kh)-shifted (TILE_H*W_row, K_pad) @ (K_pad, C_pad) bf16 matmuls.
# All slices are 8-aligned on the sublane dim (offsets are multiples of w_row).
# ---------------------------------------------------------------------------
def _conv_bias_lrelu(xt_ref, w_ref, b_ref, *, tile_h, w_row):
    p_rows, k_pad = xt_ref.shape[2], xt_ref.shape[3]
    c_pad = w_ref.shape[2]
    l_rows = tile_h * w_row

    xfull = xt_ref[...].reshape(p_rows, k_pad)       # squeeze leading 1,1 dims
    wfull = w_ref[...]                               # (3, K_pad, C_pad) bf16

    acc = jnp.zeros((l_rows, c_pad), jnp.float32)
    for kh in range(3):
        off = kh * w_row                             # multiple of 8 -> aligned
        lhs = xfull[off:off + l_rows, :]             # (L, K_pad) bf16
        acc = acc + jnp.dot(lhs, wfull[kh],
                            preferred_element_type=jnp.float32)   # MXU
    y = acc + b_ref[...]                             # (1, C_pad) broadcast
    return jnp.where(y > 0, y, NEG_SLOPE * y)        # leaky_relu (VPU)


# ---------------------------------------------------------------------------
# Pass 1: per-tile BatchNorm partials (mean, M2) only -- no y materialization.
# ---------------------------------------------------------------------------
def conv_stats_kernel(xt_ref, w_ref, b_ref, stats_ref, *, tile_h, width, w_row):
    y = _conv_bias_lrelu(xt_ref, w_ref, b_ref, tile_h=tile_h, w_row=w_row)
    cnt = float(tile_h * width)
    if w_row != width:
        # Mask the zero-padded garbage columns (only taken when W % 8 != 0).
        col = lax.broadcasted_iota(jnp.int32, (tile_h, w_row, 1), 1)
        valid = col.reshape(tile_h * w_row, 1) < width
        ym = jnp.where(valid, y, 0.0)
        tmean = jnp.sum(ym, axis=0, keepdims=True) / cnt          # (1, C_pad)
        d = jnp.where(valid, y - tmean, 0.0)
    else:
        tmean = jnp.sum(y, axis=0, keepdims=True) / cnt           # (1, C_pad)
        d = y - tmean
    tm2 = jnp.sum(d * d, axis=0, keepdims=True)                   # (1, C_pad)
    stats_ref[...] = jnp.concatenate([tmean, tm2], axis=0)[None, None]


# ---------------------------------------------------------------------------
# Pass 2: recompute conv+bias+leaky_relu, apply folded BN (y*a + c), write the
# final output densely in NHWC (no padded channels, no intermediate in HBM).
# ---------------------------------------------------------------------------
def conv_bn_kernel(xt_ref, w_ref, b_ref, a_ref, c_ref, o_ref, *,
                   tile_h, width, w_row):
    y = _conv_bias_lrelu(xt_ref, w_ref, b_ref, tile_h=tile_h, w_row=w_row)
    z = y * a_ref[...] + c_ref[...]                                # folded BN
    c_pad = z.shape[-1]
    cout = o_ref.shape[3]
    # (L, C_pad) -> (tile_h, w_row, C_pad): aligned split (w_row % 8 == 0),
    # then drop pad columns / pad channels before the dense store.
    z3 = z.reshape(tile_h, w_row, c_pad)[:, :width, :cout]
    o_ref[...] = z3.astype(o_ref.dtype)[None]


@functools.partial(jax.jit, static_argnames=("tile_h",))
def conv2d_module(x_nchw, weight, bias, gamma, beta, *, tile_h=None):
    """Forward pass of Conv2D(in_units, out_units, bn=True, act=leaky_relu)."""
    N, Cin, H, W = x_nchw.shape
    Cout = weight.shape[0]

    c_pad = _round_up(Cout, 128)     # lane-dense matmul N dim / stats lanes
    k_pad = _round_up(3 * Cin, 8)    # contraction dim: multiple of 8, NOT 128
    w_row = _round_up(W, 8)          # row width of flattened spatial rows

    if tile_h is None:
        tile_h = _pick_tile_h(N, H, w_row, c_pad)
    assert H % tile_h == 0, f"tile_h={tile_h} must divide H={H}"
    nh = H // tile_h
    n_tiles = N * nh
    l_rows = tile_h * w_row
    p_rows = (tile_h + 2) * w_row    # tile + 1-row halo on each side

    # ---- layout prep in XLA (fuses): NCHW->NHWC, kw-shift channel pack, halos
    x = jnp.transpose(x_nchw, (0, 2, 3, 1))                        # (N,H,W,Cin)
    xw = jnp.pad(x, ((0, 0), (0, 0), (1, 1), (0, 0)))              # W pad = 1
    xw3 = jnp.concatenate(                                         # (N,H,W,3Cin)
        [xw[:, :, 0:W, :], xw[:, :, 1:W + 1, :], xw[:, :, 2:W + 2, :]], axis=-1)
    xw3 = jnp.pad(xw3, ((0, 0), (0, 0), (0, w_row - W), (0, k_pad - 3 * Cin)))
    xh = jnp.pad(xw3, ((0, 0), (1, 1), (0, 0), (0, 0)))            # H halo rows
    rows = jnp.arange(nh)[:, None] * tile_h + jnp.arange(tile_h + 2)[None, :]
    xt = xh[:, rows]                              # (N, nh, tile_h+2, w_row, K)
    xt = xt.reshape(N, nh, p_rows, k_pad).astype(jnp.bfloat16)

    # weight (Cout,Cin,3,3) -> (3, 3*Cin, Cout): w3[kh, kw*Cin+ci, co]
    w3 = jnp.transpose(weight, (2, 3, 1, 0)).reshape(3, 3 * Cin, Cout)
    w3 = jnp.pad(w3, ((0, 0), (0, k_pad - 3 * Cin), (0, c_pad - Cout)))
    w3 = w3.astype(jnp.bfloat16)
    b_p = jnp.pad(bias, (0, c_pad - Cout)).reshape(1, c_pad).astype(jnp.float32)
    gamma_p = jnp.pad(gamma, (0, c_pad - Cout)).astype(jnp.float32)
    beta_p = jnp.pad(beta, (0, c_pad - Cout)).astype(jnp.float32)

    # VMEM footprint (double-buffered ins/outs + f32 accumulator) with headroom,
    # capped at 48 MiB to stay inside v7x's 64 MiB physical VMEM.
    step_bytes = (2 * p_rows * k_pad * 2 + 3 * k_pad * c_pad * 2 + 3 * c_pad * 4
                  + l_rows * c_pad * 4 + 2 * tile_h * W * Cout * 4
                  + 2 * 2 * c_pad * 4)
    cparams = pltpu.CompilerParams(
        dimension_semantics=("parallel", "parallel"),
        vmem_limit_bytes=int(min(48 * 1024 * 1024,
                                 max(16 * 1024 * 1024, 2 * step_bytes))))
    flops_pass = 2 * n_tiles * 3 * l_rows * k_pad * c_pad

    # ----------- pass 1: per-tile (mean, M2) BatchNorm partials --------------
    stats = pl.pallas_call(
        functools.partial(conv_stats_kernel, tile_h=tile_h, width=W, w_row=w_row),
        out_shape=jax.ShapeDtypeStruct((N, nh, 2, c_pad), jnp.float32),
        grid=(N, nh),
        in_specs=[
            pl.BlockSpec((1, 1, p_rows, k_pad), lambda n, j: (n, j, 0, 0)),
            pl.BlockSpec((3, k_pad, c_pad), lambda n, j: (0, 0, 0)),
            pl.BlockSpec((1, c_pad), lambda n, j: (0, 0)),
        ],
        out_specs=pl.BlockSpec((1, 1, 2, c_pad), lambda n, j: (n, j, 0, 0)),
        compiler_params=cparams,
        cost_estimate=pl.CostEstimate(
            flops=flops_pass, transcendentals=0,
            bytes_accessed=xt.size * 2 + w3.size * 2 + c_pad * 4
                           + n_tiles * 2 * c_pad * 4),
    )(xt, w3, b_p)

    # ---- tiny cross-tile combine (Chan's formula) + BN fold, in plain JAX ---
    cnt = tile_h * W                                   # valid elements per tile
    tmean = stats[:, :, 0, :].reshape(n_tiles, c_pad)
    tm2 = stats[:, :, 1, :].reshape(n_tiles, c_pad)
    gmean = jnp.mean(tmean, axis=0)
    m2 = jnp.sum(tm2, axis=0) + cnt * jnp.sum((tmean - gmean[None, :]) ** 2, axis=0)
    var = m2 / (n_tiles * cnt)                         # biased (train-mode norm)
    a_vec = gamma_p * lax.rsqrt(var + BN_EPS)
    c_vec = beta_p - gmean * a_vec

    # ----- pass 2: recompute conv+act, apply y*a + c, dense NHWC output ------
    out_nhwc = pl.pallas_call(
        functools.partial(conv_bn_kernel, tile_h=tile_h, width=W, w_row=w_row),
        out_shape=jax.ShapeDtypeStruct((N, H, W, Cout), x_nchw.dtype),
        grid=(N, nh),
        in_specs=[
            pl.BlockSpec((1, 1, p_rows, k_pad), lambda n, j: (n, j, 0, 0)),
            pl.BlockSpec((3, k_pad, c_pad), lambda n, j: (0, 0, 0)),
            pl.BlockSpec((1, c_pad), lambda n, j: (0, 0)),
            pl.BlockSpec((1, c_pad), lambda n, j: (0, 0)),
            pl.BlockSpec((1, c_pad), lambda n, j: (0, 0)),
        ],
        out_specs=pl.BlockSpec((1, tile_h, W, Cout), lambda n, j: (n, j, 0, 0)),
        compiler_params=cparams,
        cost_estimate=pl.CostEstimate(
            flops=flops_pass, transcendentals=0,
            bytes_accessed=xt.size * 2 + w3.size * 2 + 3 * c_pad * 4
                           + N * H * W * Cout * 4),
    )(xt, w3, b_p, a_vec.reshape(1, c_pad), c_vec.reshape(1, c_pad))

    # NHWC -> NCHW only to honor the PyTorch module's layout contract.
    return jnp.transpose(out_nhwc, (0, 3, 1, 2))


def reference(x_nchw, weight, bias, gamma, beta):
    """Pure-JAX (f32) reference mirroring the PyTorch module (train-mode BN)."""
    y = lax.conv_general_dilated(
        x_nchw, weight, window_strides=(1, 1), padding=((1, 1), (1, 1)),
        dimension_numbers=("NCHW", "OIHW", "NCHW"),
    ) + bias.reshape(1, -1, 1, 1)
    y = jnp.where(y > 0, y, NEG_SLOPE * y)
    mean = jnp.mean(y, axis=(0, 2, 3), keepdims=True)
    var = jnp.mean((y - mean) ** 2, axis=(0, 2, 3), keepdims=True)
    return (y - mean) * lax.rsqrt(var + BN_EPS) * gamma.reshape(1, -1, 1, 1) \
        + beta.reshape(1, -1, 1, 1)


if __name__ == "__main__":
    key = jax.random.PRNGKey(0)
    k_x, k_w, k_b = jax.random.split(key, 3)

    N, Cin, H, W = 2, 4, 16, 16
    Cout = 8

    x = jax.random.normal(k_x, (N, Cin, H, W), dtype=jnp.float32)
    # Deterministic synthetic parameters (not loading a checkpoint).
    weight = 0.1 * jax.random.normal(k_w, (Cout, Cin, 3, 3), dtype=jnp.float32)
    bias = 0.1 * jax.random.normal(k_b, (Cout,), dtype=jnp.float32)
    gamma = jnp.ones((Cout,), dtype=jnp.float32)   # nn.BatchNorm2d default
    beta = jnp.zeros((Cout,), dtype=jnp.float32)   # nn.BatchNorm2d default

    # References: full-f32, and one with bf16-rounded conv inputs (isolates the
    # deliberate bf16 MXU cast from any structural/tiling error).
    ref_f32 = reference(x, weight, bias, gamma, beta)
    ref_bf16 = reference(
        x.astype(jnp.bfloat16).astype(jnp.float32),
        weight.astype(jnp.bfloat16).astype(jnp.float32),
        bias, gamma, beta)

    # Default: tile_h=16 (whole height) -> grid (2, 1), 2 tiles (both v7x TCs).
    out = conv2d_module(x, weight, bias, gamma, beta)
    jax.block_until_ready(out)
    assert out.shape == (N, Cout, H, W)
    assert jnp.allclose(out, ref_bf16, atol=1e-3, rtol=1e-3)   # structure exact
    assert jnp.allclose(out, ref_f32, atol=5e-2, rtol=5e-2)    # bf16 rounding

    # Smaller H tile -> grid (2, 2): exercises halo rows across tiles and the
    # cross-tile two-pass BatchNorm statistics combine.
    out_tiled = conv2d_module(x, weight, bias, gamma, beta, tile_h=8)
    jax.block_until_ready(out_tiled)
    assert jnp.allclose(out_tiled, ref_bf16, atol=1e-3, rtol=1e-3)
    assert jnp.allclose(out_tiled, ref_f32, atol=5e-2, rtol=5e-2)

    print("KERNEL_OK")
</pallas_src>

<mosaic_0001>
module attributes {stable_mosaic.version = 11 : i64} {
  func.func @conv_stats_kernel(%arg0: i32, %arg1: i32, %arg2: memref<1x1x288x16xbf16, #tpu.memory_space<vmem>>, %arg3: memref<3x16x128xbf16, #tpu.memory_space<vmem>>, %arg4: memref<1x128xf32, #tpu.memory_space<vmem>>, %arg5: memref<1x1x2x128xf32, #tpu.memory_space<vmem>>) attributes {dimension_semantics = [#tpu.dimension_semantics<parallel>, #tpu.dimension_semantics<parallel>], iteration_bounds = array<i64: 2, 1>, scalar_prefetch = 0 : i64, scratch_operands = 0 : i64, tpu.core_type = #tpu.core_type<tc>, window_params = [{transform_indices = @transform_0, window_bounds = array<i64: 1, 1, 288, 16>}, {pipeline_mode = #tpu.pipeline_mode<synchronous>, transform_indices = @transform_1, window_bounds = array<i64: 3, 16, 128>}, {pipeline_mode = #tpu.pipeline_mode<synchronous>, transform_indices = @transform_2, window_bounds = array<i64: 1, 128>}, {transform_indices = @transform_3, window_bounds = array<i64: 1, 1, 2, 128>}]} {
    %c0 = arith.constant 0 : index
    %c0_0 = arith.constant 0 : index
    %c0_1 = arith.constant 0 : index
    %c0_2 = arith.constant 0 : index
    %0 = vector.load %arg2[%c0, %c0_0, %c0_1, %c0_2] : memref<1x1x288x16xbf16, #tpu.memory_space<vmem>>, vector<1x1x288x16xbf16>
    %1 = vector.shape_cast %0 : vector<1x1x288x16xbf16> to vector<288x16xbf16>
    %c0_3 = arith.constant 0 : index
    %c0_4 = arith.constant 0 : index
    %c0_5 = arith.constant 0 : index
    %2 = vector.load %arg3[%c0_3, %c0_4, %c0_5] : memref<3x16x128xbf16, #tpu.memory_space<vmem>>, vector<3x16x128xbf16>
    %cst = arith.constant 0.000000e+00 : f32
    %3 = vector.broadcast %cst : f32 to vector<256x128xf32>
    %4 = vector.extract_strided_slice %1 {offsets = [0, 0], sizes = [256, 16], strides = [1, 1]} : vector<288x16xbf16> to vector<256x16xbf16>
    %5 = vector.extract_strided_slice %2 {offsets = [0, 0, 0], sizes = [1, 16, 128], strides = [1, 1, 1]} : vector<3x16x128xbf16> to vector<1x16x128xbf16>
    %6 = vector.shape_cast %5 : vector<1x16x128xbf16> to vector<16x128xbf16>
    %cst_6 = arith.constant dense<0.000000e+00> : vector<256x128xf32>
    %7 = tpu.matmul %4, %6, %cst_6 {dimension_numbers = #tpu.dot_dimension_numbers<[1], [0], [0], [1], [0, 0, 1, 1], [], []>} : vector<256x16xbf16>, vector<16x128xbf16>, vector<256x128xf32> -> vector<256x128xf32>
    %8 = arith.addf %3, %7 : vector<256x128xf32>
    %9 = vector.extract_strided_slice %1 {offsets = [16, 0], sizes = [256, 16], strides = [1, 1]} : vector<288x16xbf16> to vector<256x16xbf16>
    %10 = vector.extract_strided_slice %2 {offsets = [1, 0, 0], sizes = [1, 16, 128], strides = [1, 1, 1]} : vector<3x16x128xbf16> to vector<1x16x128xbf16>
    %11 = vector.shape_cast %10 : vector<1x16x128xbf16> to vector<16x128xbf16>
    %cst_7 = arith.constant dense<0.000000e+00> : vector<256x128xf32>
    %12 = tpu.matmul %9, %11, %cst_7 {dimension_numbers = #tpu.dot_dimension_numbers<[1], [0], [0], [1], [0, 0, 1, 1], [], []>} : vector<256x16xbf16>, vector<16x128xbf16>, vector<256x128xf32> -> vector<256x128xf32>
    %13 = arith.addf %8, %12 : vector<256x128xf32>
    %14 = vector.extract_strided_slice %1 {offsets = [32, 0], sizes = [256, 16], strides = [1, 1]} : vector<288x16xbf16> to vector<256x16xbf16>
    %15 = vector.extract_strided_slice %2 {offsets = [2, 0, 0], sizes = [1, 16, 128], strides = [1, 1, 1]} : vector<3x16x128xbf16> to vector<1x16x128xbf16>
    %16 = vector.shape_cast %15 : vector<1x16x128xbf16> to vector<16x128xbf16>
    %cst_8 = arith.constant dense<0.000000e+00> : vector<256x128xf32>
    %17 = tpu.matmul %14, %16, %cst_8 {dimension_numbers = #tpu.dot_dimension_numbers<[1], [0], [0], [1], [0, 0, 1, 1], [], []>} : vector<256x16xbf16>, vector<16x128xbf16>, vector<256x128xf32> -> vector<256x128xf32>
    %18 = arith.addf %13, %17 : vector<256x128xf32>
    %c0_9 = arith.constant 0 : index
    %c0_10 = arith.constant 0 : index
    %19 = vector.load %arg4[%c0_9, %c0_10] : memref<1x128xf32, #tpu.memory_space<vmem>>, vector<1x128xf32>
    %20 = vector.broadcast %19 : vector<1x128xf32> to vector<256x128xf32>
    %21 = arith.addf %18, %20 : vector<256x128xf32>
    %cst_11 = arith.constant 0.000000e+00 : f32
    %22 = vector.broadcast %cst_11 : f32 to vector<256x128xf32>
    %23 = arith.cmpf ogt, %21, %22 : vector<256x128xf32>
    %cst_12 = arith.constant 0.00999999977 : f32
    %24 = vector.broadcast %cst_12 : f32 to vector<256x128xf32>
    %25 = arith.mulf %24, %21 : vector<256x128xf32>
    %26 = arith.select %23, %21, %25 : vector<256x128xi1>, vector<256x128xf32>
    %cst_13 = arith.constant dense<0.000000e+00> : vector<128xf32>
    %27 = vector.multi_reduction <add>, %26, %cst_13 [0] : vector<256x128xf32> to vector<128xf32>
    %28 = vector.shape_cast %27 : vector<128xf32> to vector<1x128xf32>
    %cst_14 = arith.constant 2.560000e+02 : f32
    %29 = vector.broadcast %cst_14 : f32 to vector<1x128xf32>
    %30 = arith.divf %28, %29 : vector<1x128xf32>
    %31 = vector.broadcast %30 : vector<1x128xf32> to vector<256x128xf32>
    %32 = arith.subf %26, %31 : vector<256x128xf32>
    %33 = arith.mulf %32, %32 : vector<256x128xf32>
    %cst_15 = arith.constant dense<0.000000e+00> : vector<128xf32>
    %34 = vector.multi_reduction <add>, %33, %cst_15 [0] : vector<256x128xf32> to vector<128xf32>
    %35 = vector.shape_cast %34 : vector<128xf32> to vector<1x128xf32>
    %36 = tpu.concatenate %30, %35 in 0 : vector<1x128xf32>, vector<1x128xf32> -> vector<2x128xf32>
    %37 = vector.shape_cast %36 : vector<2x128xf32> to vector<1x1x2x128xf32>
    %c0_16 = arith.constant 0 : index
    %c0_17 = arith.constant 0 : index
    %c0_18 = arith.constant 0 : index
    %c0_19 = arith.constant 0 : index
    %38 = vector.load %arg5[%c0_16, %c0_17, %c0_18, %c0_19] : memref<1x1x2x128xf32, #tpu.memory_space<vmem>>, vector<1x1x2x128xf32>
    tpu.vector_store %arg5[%c0_16, %c0_17, %c0_18, %c0_19], %37 {strides = array<i32>} : memref<1x1x2x128xf32, #tpu.memory_space<vmem>>, vector<1x1x2x128xf32>,
    return
  }
  func.func @transform_0(%arg0: i32, %arg1: i32) -> (i32, i32, i32, i32) {
    %c0_i32 = arith.constant 0 : i32
    %c0_i32_0 = arith.constant 0 : i32
    %c0_i32_1 = arith.constant 0 : i32
    return %arg0, %arg1, %c0_i32, %c0_i32_0 : i32, i32, i32, i32
  }
  func.func @transform_1(%arg0: i32, %arg1: i32) -> (i32, i32, i32) {
    %c0_i32 = arith.constant 0 : i32
    %c0_i32_0 = arith.constant 0 : i32
    %c0_i32_1 = arith.constant 0 : i32
    %c0_i32_2 = arith.constant 0 : i32
    return %c0_i32, %c0_i32_0, %c0_i32_1 : i32, i32, i32
  }
  func.func @transform_2(%arg0: i32, %arg1: i32) -> (i32, i32) {
    %c0_i32 = arith.constant 0 : i32
    %c0_i32_0 = arith.constant 0 : i32
    %c0_i32_1 = arith.constant 0 : i32
    return %c0_i32, %c0_i32_0 : i32, i32
  }
  func.func @transform_3(%arg0: i32, %arg1: i32) -> (i32, i32, i32, i32) {
    %c0_i32 = arith.constant 0 : i32
    %c0_i32_0 = arith.constant 0 : i32
    %c0_i32_1 = arith.constant 0 : i32
    return %arg0, %arg1, %c0_i32, %c0_i32_0 : i32, i32, i32, i32
  }
}

module attributes {stable_mosaic.version = 11 : i64} {
  func.func @conv_bn_kernel(%arg0: i32, %arg1: i32, %arg2: memref<1x1x288x16xbf16, #tpu.memory_space<vmem>>, %arg3: memref<3x16x128xbf16, #tpu.memory_space<vmem>>, %arg4: memref<1x128xf32, #tpu.memory_space<vmem>>, %arg5: memref<1x128xf32, #tpu.memory_space<vmem>>, %arg6: memref<1x128xf32, #tpu.memory_space<vmem>>, %arg7: memref<1x16x16x8xf32, #tpu.memory_space<vmem>>) attributes {dimension_semantics = [#tpu.dimension_semantics<parallel>, #tpu.dimension_semantics<parallel>], iteration_bounds = array<i64: 2, 1>, scalar_prefetch = 0 : i64, scratch_operands = 0 : i64, tpu.core_type = #tpu.core_type<tc>, window_params = [{transform_indices = @transform_0, window_bounds = array<i64: 1, 1, 288, 16>}, {pipeline_mode = #tpu.pipeline_mode<synchronous>, transform_indices = @transform_1, window_bounds = array<i64: 3, 16, 128>}, {pipeline_mode = #tpu.pipeline_mode<synchronous>, transform_indices = @transform_2, window_bounds = array<i64: 1, 128>}, {pipeline_mode = #tpu.pipeline_mode<synchronous>, transform_indices = @transform_3, window_bounds = array<i64: 1, 128>}, {pipeline_mode = #tpu.pipeline_mode<synchronous>, transform_indices = @transform_4, window_bounds = array<i64: 1, 128>}, {transform_indices = @transform_5, window_bounds = array<i64: 1, 16, 16, 8>}]} {
    %c0 = arith.constant 0 : index
    %c0_0 = arith.constant 0 : index
    %c0_1 = arith.constant 0 : index
    %c0_2 = arith.constant 0 : index
    %0 = vector.load %arg2[%c0, %c0_0, %c0_1, %c0_2] : memref<1x1x288x16xbf16, #tpu.memory_space<vmem>>, vector<1x1x288x16xbf16>
    %1 = vector.shape_cast %0 : vector<1x1x288x16xbf16> to vector<288x16xbf16>
    %c0_3 = arith.constant 0 : index
    %c0_4 = arith.constant 0 : index
    %c0_5 = arith.constant 0 : index
    %2 = vector.load %arg3[%c0_3, %c0_4, %c0_5] : memref<3x16x128xbf16, #tpu.memory_space<vmem>>, vector<3x16x128xbf16>
    %cst = arith.constant 0.000000e+00 : f32
    %3 = vector.broadcast %cst : f32 to vector<256x128xf32>
    %4 = vector.extract_strided_slice %1 {offsets = [0, 0], sizes = [256, 16], strides = [1, 1]} : vector<288x16xbf16> to vector<256x16xbf16>
    %5 = vector.extract_strided_slice %2 {offsets = [0, 0, 0], sizes = [1, 16, 128], strides = [1, 1, 1]} : vector<3x16x128xbf16> to vector<1x16x128xbf16>
    %6 = vector.shape_cast %5 : vector<1x16x128xbf16> to vector<16x128xbf16>
    %cst_6 = arith.constant dense<0.000000e+00> : vector<256x128xf32>
    %7 = tpu.matmul %4, %6, %cst_6 {dimension_numbers = #tpu.dot_dimension_numbers<[1], [0], [0], [1], [0, 0, 1, 1], [], []>} : vector<256x16xbf16>, vector<16x128xbf16>, vector<256x128xf32> -> vector<256x128xf32>
    %8 = arith.addf %3, %7 : vector<256x128xf32>
    %9 = vector.extract_strided_slice %1 {offsets = [16, 0], sizes = [256, 16], strides = [1, 1]} : vector<288x16xbf16> to vector<256x16xbf16>
    %10 = vector.extract_strided_slice %2 {offsets = [1, 0, 0], sizes = [1, 16, 128], strides = [1, 1, 1]} : vector<3x16x128xbf16> to vector<1x16x128xbf16>
    %11 = vector.shape_cast %10 : vector<1x16x128xbf16> to vector<16x128xbf16>
    %cst_7 = arith.constant dense<0.000000e+00> : vector<256x128xf32>
    %12 = tpu.matmul %9, %11, %cst_7 {dimension_numbers = #tpu.dot_dimension_numbers<[1], [0], [0], [1], [0, 0, 1, 1], [], []>} : vector<256x16xbf16>, vector<16x128xbf16>, vector<256x128xf32> -> vector<256x128xf32>
    %13 = arith.addf %8, %12 : vector<256x128xf32>
    %14 = vector.extract_strided_slice %1 {offsets = [32, 0], sizes = [256, 16], strides = [1, 1]} : vector<288x16xbf16> to vector<256x16xbf16>
    %15 = vector.extract_strided_slice %2 {offsets = [2, 0, 0], sizes = [1, 16, 128], strides = [1, 1, 1]} : vector<3x16x128xbf16> to vector<1x16x128xbf16>
    %16 = vector.shape_cast %15 : vector<1x16x128xbf16> to vector<16x128xbf16>
    %cst_8 = arith.constant dense<0.000000e+00> : vector<256x128xf32>
    %17 = tpu.matmul %14, %16, %cst_8 {dimension_numbers = #tpu.dot_dimension_numbers<[1], [0], [0], [1], [0, 0, 1, 1], [], []>} : vector<256x16xbf16>, vector<16x128xbf16>, vector<256x128xf32> -> vector<256x128xf32>
    %18 = arith.addf %13, %17 : vector<256x128xf32>
    %c0_9 = arith.constant 0 : index
    %c0_10 = arith.constant 0 : index
    %19 = vector.load %arg4[%c0_9, %c0_10] : memref<1x128xf32, #tpu.memory_space<vmem>>, vector<1x128xf32>
    %20 = vector.broadcast %19 : vector<1x128xf32> to vector<256x128xf32>
    %21 = arith.addf %18, %20 : vector<256x128xf32>
    %cst_11 = arith.constant 0.000000e+00 : f32
    %22 = vector.broadcast %cst_11 : f32 to vector<256x128xf32>
    %23 = arith.cmpf ogt, %21, %22 : vector<256x128xf32>
    %cst_12 = arith.constant 0.00999999977 : f32
    %24 = vector.broadcast %cst_12 : f32 to vector<256x128xf32>
    %25 = arith.mulf %24, %21 : vector<256x128xf32>
    %26 = arith.select %23, %21, %25 : vector<256x128xi1>, vector<256x128xf32>
    %c0_13 = arith.constant 0 : index
    %c0_14 = arith.constant 0 : index
    %27 = vector.load %arg5[%c0_13, %c0_14] : memref<1x128xf32, #tpu.memory_space<vmem>>, vector<1x128xf32>
    %28 = vector.broadcast %27 : vector<1x128xf32> to vector<256x128xf32>
    %29 = arith.mulf %26, %28 : vector<256x128xf32>
    %c0_15 = arith.constant 0 : index
    %c0_16 = arith.constant 0 : index
    %30 = vector.load %arg6[%c0_15, %c0_16] : memref<1x128xf32, #tpu.memory_space<vmem>>, vector<1x128xf32>
    %31 = vector.broadcast %30 : vector<1x128xf32> to vector<256x128xf32>
    %32 = arith.addf %29, %31 : vector<256x128xf32>
    %33 = vector.shape_cast %32 : vector<256x128xf32> to vector<16x16x128xf32>
    %34 = vector.extract_strided_slice %33 {offsets = [0, 0, 0], sizes = [16, 16, 8], strides = [1, 1, 1]} : vector<16x16x128xf32> to vector<16x16x8xf32>
    %35 = vector.shape_cast %34 : vector<16x16x8xf32> to vector<1x16x16x8xf32>
    %c0_17 = arith.constant 0 : index
    %c0_18 = arith.constant 0 : index
    %c0_19 = arith.constant 0 : index
    %c0_20 = arith.constant 0 : index
    %36 = vector.load %arg7[%c0_17, %c0_18, %c0_19, %c0_20] : memref<1x16x16x8xf32, #tpu.memory_space<vmem>>, vector<1x16x16x8xf32>
    tpu.vector_store %arg7[%c0_17, %c0_18, %c0_19, %c0_20], %35 {strides = array<i32>} : memref<1x16x16x8xf32, #tpu.memory_space<vmem>>, vector<1x16x16x8xf32>,
    return
  }
  func.func @transform_0(%arg0: i32, %arg1: i32) -> (i32, i32, i32, i32) {
    %c0_i32 = arith.constant 0 : i32
    %c0_i32_0 = arith.constant 0 : i32
    %c0_i32_1 = arith.constant 0 : i32
    return %arg0, %arg1, %c0_i32, %c0_i32_0 : i32, i32, i32, i32
  }
  func.func @transform_1(%arg0: i32, %arg1: i32) -> (i32, i32, i32) {
    %c0_i32 = arith.constant 0 : i32
    %c0_i32_0 = arith.constant 0 : i32
    %c0_i32_1 = arith.constant 0 : i32
    %c0_i32_2 = arith.constant 0 : i32
    return %c0_i32, %c0_i32_0, %c0_i32_1 : i32, i32, i32
  }
  func.func @transform_2(%arg0: i32, %arg1: i32) -> (i32, i32) {
    %c0_i32 = arith.constant 0 : i32
    %c0_i32_0 = arith.constant 0 : i32
    %c0_i32_1 = arith.constant 0 : i32
    return %c0_i32, %c0_i32_0 : i32, i32
  }
  func.func @transform_3(%arg0: i32, %arg1: i32) -> (i32, i32) {
    %c0_i32 = arith.constant 0 : i32
    %c0_i32_0 = arith.constant 0 : i32
    %c0_i32_1 = arith.constant 0 : i32
    return %c0_i32, %c0_i32_0 : i32, i32
  }
  func.func @transform_4(%arg0: i32, %arg1: i32) -> (i32, i32) {
    %c0_i32 = arith.constant 0 : i32
    %c0_i32_0 = arith.constant 0 : i32
    %c0_i32_1 = arith.constant 0 : i32
    return %c0_i32, %c0_i32_0 : i32, i32
  }
  func.func @transform_5(%arg0: i32, %arg1: i32) -> (i32, i32, i32, i32) {
    %c0_i32 = arith.constant 0 : i32
    %c0_i32_0 = arith.constant 0 : i32
    %c0_i32_1 = arith.constant 0 : i32
    return %arg0, %arg1, %c0_i32, %c0_i32_0 : i32, i32, i32, i32
  }
}

</mosaic_0001>

<bundles_post_ra>
// kernel: conv2d_module.3
= control target key start
LH: loop header
LB: loop body
LE: loop exit
PB: predicated region body
PF: predicated region fallthrough
CT: control target
= control target key end

     0   :  { %s1351_s18 = smov 0   ;;  %s1353_s19 = smov 0   ;;  %s1719_s0 = inlined_call_operand.vmem [shape: bf16[2,1,288,16], index: 0, kind: input, shape index: {}]   ;;  %s1720_s1 = inlined_call_operand.vmem [shape: bf16[3,16,128], index: 1, kind: input, shape index: {}]   ;;  %s1721_s2 = inlined_call_operand.vmem [shape: f32[1,128], index: 2, kind: input, shape index: {}]   ;;  %s1722_s3 = inlined_call_operand.vmem [shape: f32[1,128], index: 3, kind: input, shape index: {}]   ;;  %s1723_s4 = inlined_call_operand.vmem [shape: f32[1,128], index: 4, kind: input, shape index: {}]   ;;  %s1724_s5 = inlined_call_operand.vmem [shape: f32[2,16,16,8], index: 5, kind: output, shape index: {}]  }
   0x1   :  { %s1355_s20 = smov 0  }
   0x2 LB: > { %s27_s21 = sadd.s32 1, %s1315_s19  ;;  %p1106_p0 = scmp.ge.s32.totalorder %s1319_s20, 1  ;;  %s1319_s20 = sphi %s1355_s20, %s15_s20   ;;  %s1315_s19 = sphi %s1353_s19, %s1726_s19   ;;  %s1311_s18 = sphi %s1351_s18, %s1725_s18  }
   0x3   : > { %p29_p1 = scmp.ge.s32.totalorder %s27_s21, 2  ;;  %p207_p2 = scmp.lt.s32.totalorder %s1319_s20, 3 }
   0x5   : > { %s1728_s21 = smov (%p29_p1, %s27_s21), 0  ;;  %p208_p3 = pnand %p1106_p0, %p207_p2 }
   0x6   : > { %p244_p4 = scmp.lt.s32.totalorder (!%p208_p3), %s1311_s18, 1 }
   0x7   : > { %211 = sbr.rel (%p208_p3) target bundleno = 347 (0x15b), region = 40 }
   0xc   : > { %v1264_v0 = vld [vmem:[%s1720_s1 + $0x8] sm:$0xff]  ;;  %v1263_v1 = vld [vmem:[%s1720_s1] sm:$0xff]  ;;  %v1265_v2 = vld [vmem:[%s1720_s1 + $0x10] sm:$0xff]  ;;  %s1730_s18 = smov (!%p244_p4, %s1311_s18), 1  ;;  %vm393_vm0 = vcmask 130048   ;;  %vm973_vm2 = vcmask 64512  }
   0xd   : > { %449 = vmatpush.bf16.msra.mxu0 %v1264_v0  ;;  %1266 = vmatpush.bf16.msra.mxu3 %v1264_v0  ;;  %s1269_s28 = smul.u32 144, %s1730_s18  ;;  %v1460_v23 = vld [vmem:[%s1721_s2] ss:$0 sm:$0xff]  ;;  %s1244_s11 = sshll.u32 %s1730_s18, 8 }
   0xe   : > { %552 = vmatpush.bf16.msra.mxu1 %v1263_v1  ;;  %655 = vmatpush.bf16.msra.mxu2 %v1265_v2  ;;  %v1466_v29 = vld [vmem:[%s1722_s3] ss:$0 sm:$0xff]  ;;  %s1480_s16 = scalar_lea.vmem %s1724_s5, %s1244_s11 }
   0xf   : > { %s1384_s6 = scalar_lea.vmem %s1719_s0, %s1269_s28  ;;  %v1472_v31 = vld [vmem:[%s1723_s4] ss:$0 sm:$0xff] }
  0x10   : > { %v1246_v3 = vld [vmem:[%s1384_s6 + $0x8] sm:$0xff]  ;;  %v1245_v5 = vld [vmem:[%s1384_s6] sm:$0xff]  ;;  %v1247_v6 = vld [vmem:[%s1384_s6 + $0x10] sm:$0xff] }
  0x11   : > { %1267 = vmatpush.bf16.msrb.mxu3 %v1263_v1  ;;  %v1388_v4 = vld [vmem:[%s1384_s6 + $0x68] sm:$0xff]  ;;  %1178 = vmatmul.msk.bf16.vlgmr.msra.gmra.mxu0 %vm393_vm0, %v1246_v3  ;;  %v1259_v7 = vld [vmem:[%s1384_s6 + $0x70] sm:$0xff]  ;;  %v1248_v8 = vld [vmem:[%s1384_s6 + $0x18] sm:$0xff] }
  0x12   : > { %1190 = vmatmul.msk.bf16.vlgmr.msra.gmra.mxu3 %vm393_vm0, %v1388_v4  ;;  %1202 = vmatmul.msk.bf16.vlgmr.msra.gmra.mxu1 %vm393_vm0, %v1245_v5  ;;  %v1404_v9 = vld [vmem:[%s1384_s6 + $0x78] sm:$0xff]  ;;  %v1249_v10 = vld [vmem:[%s1384_s6 + $0x20] sm:$0xff]  ;;  %v1250_v12 = vld [vmem:[%s1384_s6 + $0x28] sm:$0xff] }
  0x13   : > { %1226 = vmatmul.msk.bf16.vlgmr.msra.gmra.mxu2 %vm393_vm0, %v1247_v6  ;;  %v1413_v11 = vld [vmem:[%s1384_s6 + $0x80] sm:$0xff]  ;;  %v1251_v14 = vld [vmem:[%s1384_s6 + $0x30] sm:$0xff]  ;;  %v1252_v15 = vld [vmem:[%s1384_s6 + $0x38] sm:$0xff] }
  0x14   : > { %v1422_v13 = vld [vmem:[%s1384_s6 + $0x60] sm:$0xff]  ;;  %v1254_v17 = vld [vmem:[%s1384_s6 + $0x48] sm:$0xff]  ;;  %v1448_v19 = vld [vmem:[%s1384_s6 + $0x50] sm:$0xff] }
  0x15   : > { %1268 = vmatpush.bf16.msra.mxu3 %v1265_v2  ;;  %v1253_v16 = vld [vmem:[%s1384_s6 + $0x40] sm:$0xff]  ;;  %v1483_v39 = vld [vmem:[%s1384_s6 + $0x58] sm:$0xff] }
  0x21   : > { %1179 = vmatmul.msk.bf16.gmra.mxu0 %vm393_vm0, %v1247_v6 }
  0x22   : > { %1191 = vmatmul.msk.bf16.gmra.mxu3 %vm393_vm0, %v1259_v7  ;;  %1203 = vmatmul.msk.bf16.gmra.mxu1 %vm393_vm0, %v1246_v3 }
  0x23   : > { %1227 = vmatmul.msk.bf16.gmra.mxu2 %vm393_vm0, %v1248_v8 }
  0x31   : > { %1180 = vmatmul.msk.bf16.gmra.mxu0 %vm393_vm0, %v1248_v8 }
  0x32   : > { %1192 = vmatmul.msk.bf16.gmra.mxu3 %vm393_vm0, %v1404_v9  ;;  %1204 = vmatmul.msk.bf16.gmra.mxu1 %vm393_vm0, %v1247_v6 }
  0x33   : > { %1228 = vmatmul.msk.bf16.gmra.mxu2 %vm393_vm0, %v1249_v10 }
  0x41   : > { %1181 = vmatmul.msk.bf16.gmra.mxu0 %vm393_vm0, %v1249_v10 }
  0x42   : > { %1193 = vmatmul.msk.bf16.gmra.mxu3 %vm393_vm0, %v1413_v11  ;;  %1205 = vmatmul.msk.bf16.gmra.mxu1 %vm393_vm0, %v1248_v8 }
  0x43   : > { %1229 = vmatmul.msk.bf16.gmra.mxu2 %vm393_vm0, %v1250_v12 }
  0x51   : > { %1182 = vmatmul.msk.bf16.gmra.mxu0 %vm393_vm0, %v1250_v12 }
  0x52   : > { %1214 = vmatmul.msk.bf16.vlgmr.msrb.gmra.mxu3 %vm393_vm0, %v1422_v13  ;;  %1206 = vmatmul.msk.bf16.gmra.mxu1 %vm393_vm0, %v1249_v10 }
  0x53   : > { %1230 = vmatmul.msk.bf16.gmra.mxu2 %vm393_vm0, %v1251_v14 }
  0x61   : > { %1183 = vmatmul.msk.bf16.gmra.mxu0 %vm393_vm0, %v1251_v14 }
  0x62   : > { %1215 = vmatmul.msk.bf16.gmra.mxu3 %vm393_vm0, %v1388_v4  ;;  %1207 = vmatmul.msk.bf16.gmra.mxu1 %vm393_vm0, %v1250_v12 }
  0x63   : > { %1231 = vmatmul.msk.bf16.gmra.mxu2 %vm393_vm0, %v1252_v15 }
  0x71   : > { %1184 = vmatmul.msk.bf16.gmra.mxu0 %vm393_vm0, %v1252_v15 }
  0x72   : > { %1216 = vmatmul.msk.bf16.gmra.mxu3 %vm393_vm0, %v1259_v7  ;;  %1208 = vmatmul.msk.bf16.gmra.mxu1 %vm393_vm0, %v1251_v14 }
  0x73   : > { %1232 = vmatmul.msk.bf16.gmra.mxu2 %vm393_vm0, %v1253_v16 }
  0x81   : > { %1185 = vmatmul.msk.bf16.gmra.mxu0 %vm393_vm0, %v1253_v16 }
  0x82   : > { %1217 = vmatmul.msk.bf16.gmra.mxu3 %vm393_vm0, %v1404_v9  ;;  %1209 = vmatmul.msk.bf16.gmra.mxu1 %vm393_vm0, %v1252_v15 }
  0x83   : > { %1233 = vmatmul.msk.bf16.gmra.mxu2 %vm393_vm0, %v1254_v17 }
  0x8e   : > { %v451_v18 = vpop.f32.mrf.mxu0 }
  0x8f   : > { %v554_v20 = vpop.f32.mrf.mxu1 }
  0x90   : > { %v555_v21 = vadd.f32 %v554_v20, %v451_v18  ;;  %v1262_v20 = vld [vmem:[%s1384_s6 + $0x88] sm:$0xff] }
  0x91   : > { %1186 = vmatmul.msk.bf16.gmra.mxu0 %vm393_vm0, %v1254_v17 }
  0x92   : > { %1238 = vmatmul.msk.bf16.vlgmr.msra.gmra.mxu3 %vm393_vm0, %v1259_v7  ;;  %1210 = vmatmul.msk.bf16.gmra.mxu1 %vm393_vm0, %v1253_v16 }
  0x93   : > { %1234 = vmatmul.msk.bf16.gmra.mxu2 %vm393_vm0, %v1448_v19 }
  0x95   : > { %v1455_v22 = vpop.f32.mrf.mxu3 }
  0x96   : > { %v657_v24 = vpop.f32.mrf.mxu2  ;;  %v453_v26 = vpop.f32.mrf.mxu0 }
  0x97   : > { %v737_v25 = vadd.f32 %v657_v24, %v555_v21  ;;  %v556_v27 = vpop.f32.mrf.mxu1 }
  0x98   : > { %v557_v33 = vadd.f32 %v556_v27, %v453_v26 }
  0x99   : > { %v773_v28 = vadd.f32 %v1460_v23, %v737_v25 }
  0x9b   : > { %vm805_vm1 = vcmp.gt.f32.partialorder %v773_v28, 0.0  ;;  %v837_v30 = vmul.f32 0.01, %v773_v28 }
  0x9d   : > { %v869_v32 = vsel %vm805_vm1, %v773_v28, %v837_v30  ;;  %v1474_v34 = vpop.f32.mrf.mxu3 }
  0x9e   : > { %v905_v35 = vmul.f32 %v1466_v29, %v869_v32  ;;  %v659_v36 = vpop.f32.mrf.mxu2  ;;  %v456_v38 = vpop.f32.mrf.mxu0 }
  0x9f   : > { %v738_v37 = vadd.f32 %v659_v36, %v557_v33  ;;  %v559_v41 = vpop.f32.mrf.mxu1 }
  0xa0   : > { %v941_v40 = vadd.f32 %v1472_v31, %v905_v35  ;;  %v560_v44 = vadd.f32 %v559_v41, %v456_v38 }
  0xa1   : > { %v774_v42 = vadd.f32 %v1460_v23, %v738_v37  ;;  %1187 = vmatmul.msk.bf16.gmra.mxu0 %vm393_vm0, %v1448_v19 }
  0xa2   : > { %974 = vst.msk [vmem:[%s1480_s16] sm:$0xff] %vm973_vm2, %v941_v40  ;;  %1239 = vmatmul.msk.bf16.gmra.mxu3 %vm393_vm0, %v1404_v9  ;;  %1211 = vmatmul.msk.bf16.gmra.mxu1 %vm393_vm0, %v1254_v17 }
  0xa3   : > { %vm806_vm3 = vcmp.gt.f32.partialorder %v774_v42, 0.0  ;;  %v838_v43 = vmul.f32 0.01, %v774_v42  ;;  %1235 = vmatmul.msk.bf16.gmra.mxu2 %vm393_vm0, %v1483_v39 }
  0xa5   : > { %v870_v45 = vsel %vm806_vm3, %v774_v42, %v838_v43  ;;  %v1496_v46 = vpop.f32.mrf.mxu3 }
  0xa6   : > { %v906_v47 = vmul.f32 %v1466_v29, %v870_v45  ;;  %v662_v48 = vpop.f32.mrf.mxu2  ;;  %v458_v50 = vpop.f32.mrf.mxu0 }
  0xa7   : > { %v739_v49 = vadd.f32 %v662_v48, %v560_v44  ;;  %v561_v52 = vpop.f32.mrf.mxu1 }
  0xa8   : > { %v942_v51 = vadd.f32 %v1472_v31, %v906_v47  ;;  %v562_v56 = vadd.f32 %v561_v52, %v458_v50 }
  0xa9   : > { %v775_v53 = vadd.f32 %v1460_v23, %v739_v49 }
  0xaa   : > { %975 = vst.msk [vmem:[%s1480_s16 + $0x8] sm:$0xff] %vm973_vm2, %v942_v51 }
  0xab   : > { %vm807_vm4 = vcmp.gt.f32.partialorder %v775_v53, 0.0  ;;  %v839_v54 = vmul.f32 0.01, %v775_v53 }
  0xad   : > { %v871_v55 = vsel %vm807_vm4, %v775_v53, %v839_v54  ;;  %v1503_v57 = vpop.f32.mrf.mxu3 }
  0xae   : > { %v907_v58 = vmul.f32 %v1466_v29, %v871_v55  ;;  %v664_v59 = vpop.f32.mrf.mxu2  ;;  %v461_v61 = vpop.f32.mrf.mxu0 }
  0xaf   : > { %v740_v60 = vadd.f32 %v664_v59, %v562_v56  ;;  %v564_v63 = vpop.f32.mrf.mxu1 }
  0xb0   : > { %v943_v62 = vadd.f32 %v1472_v31, %v907_v58  ;;  %v565_v2 = vadd.f32 %v564_v63, %v461_v61 }
  0xb1   : > { %v776_v0 = vadd.f32 %v1460_v23, %v740_v60  ;;  %1188 = vmatmul.msk.bf16.gmra.mxu0 %vm393_vm0, %v1483_v39 }
  0xb2   : > { %976 = vst.msk [vmem:[%s1480_s16 + $0x10] sm:$0xff] %vm973_vm2, %v943_v62  ;;  %1240 = vmatmul.msk.bf16.gmra.mxu3 %vm393_vm0, %v1413_v11  ;;  %1212 = vmatmul.msk.bf16.gmra.mxu1 %vm393_vm0, %v1448_v19 }
  0xb3   : > { %vm808_vm5 = vcmp.gt.f32.partialorder %v776_v0, 0.0  ;;  %v840_v1 = vmul.f32 0.01, %v776_v0  ;;  %1236 = vmatmul.msk.bf16.gmra.mxu2 %vm393_vm0, %v1422_v13 }
  0xb5   : > { %v872_v3 = vsel %vm808_vm5, %v776_v0, %v840_v1  ;;  %v1518_v5 = vpop.f32.mrf.mxu3 }
  0xb6   : > { %v908_v6 = vmul.f32 %v1466_v29, %v872_v3  ;;  %v667_v7 = vpop.f32.mrf.mxu2  ;;  %v463_v9 = vpop.f32.mrf.mxu0 }
  0xb7   : > { %v741_v8 = vadd.f32 %v667_v7, %v565_v2  ;;  %v566_v11 = vpop.f32.mrf.mxu1 }
  0xb8   : > { %v944_v10 = vadd.f32 %v1472_v31, %v908_v6  ;;  %v567_v16 = vadd.f32 %v566_v11, %v463_v9 }
  0xb9   : > { %v777_v12 = vadd.f32 %v1460_v23, %v741_v8 }
  0xba   : > { %977 = vst.msk [vmem:[%s1480_s16 + $0x18] sm:$0xff] %vm973_vm2, %v944_v10 }
  0xbb   : > { %vm809_vm6 = vcmp.gt.f32.partialorder %v777_v12, 0.0  ;;  %v841_v14 = vmul.f32 0.01, %v777_v12 }
  0xbd   : > { %v873_v15 = vsel %vm809_vm6, %v777_v12, %v841_v14  ;;  %v1525_v17 = vpop.f32.mrf.mxu3 }
  0xbe   : > { %v909_v18 = vmul.f32 %v1466_v29, %v873_v15  ;;  %v669_v19 = vpop.f32.mrf.mxu2  ;;  %v466_v24 = vpop.f32.mrf.mxu0 }
  0xbf   : > { %v742_v21 = vadd.f32 %v669_v19, %v567_v16  ;;  %v569_v26 = vpop.f32.mrf.mxu1 }
  0xc0   : > { %v945_v25 = vadd.f32 %v1472_v31, %v909_v18  ;;  %v570_v30 = vadd.f32 %v569_v26, %v466_v24 }
  0xc1   : > { %v778_v27 = vadd.f32 %v1460_v23, %v742_v21  ;;  %1189 = vmatmul.msk.bf16.gmra.mxu0 %vm393_vm0, %v1422_v13 }
  0xc2   : > { %978 = vst.msk [vmem:[%s1480_s16 + $0x20] sm:$0xff] %vm973_vm2, %v945_v25  ;;  %1241 = vmatmul.msk.bf16.gmra.mxu3 %vm393_vm0, %v1262_v20  ;;  %1213 = vmatmul.msk.bf16.gmra.mxu1 %vm393_vm0, %v1483_v39 }
  0xc3   : > { %vm810_vm7 = vcmp.gt.f32.partialorder %v778_v27, 0.0  ;;  %v842_v28 = vmul.f32 0.01, %v778_v27  ;;  %1237 = vmatmul.msk.bf16.gmra.mxu2 %vm393_vm0, %v1388_v4 }
  0xc5   : > { %v874_v32 = vsel %vm810_vm7, %v778_v27, %v842_v28  ;;  %v1540_v33 = vpop.f32.mrf.mxu3 }
  0xc6   : > { %v910_v35 = vmul.f32 %v1466_v29, %v874_v32  ;;  %v672_v36 = vpop.f32.mrf.mxu2  ;;  %v468_v13 = vpop.f32.mrf.mxu0 }
  0xc7   : > { %v743_v37 = vadd.f32 %v672_v36, %v570_v30  ;;  %v571_v40 = vpop.f32.mrf.mxu1 }
  0xc8   : > { %v946_v38 = vadd.f32 %v1472_v31, %v910_v35  ;;  %v572_v4 = vadd.f32 %v571_v40, %v468_v13 }
  0xc9   : > { %v779_v41 = vadd.f32 %v1460_v23, %v743_v37 }
  0xca   : > { %979 = vst.msk [vmem:[%s1480_s16 + $0x28] sm:$0xff] %vm973_vm2, %v946_v38 }
  0xcb   : > { %vm811_vm8 = vcmp.gt.f32.partialorder %v779_v41, 0.0  ;;  %v843_v39 = vmul.f32 0.01, %v779_v41 }
  0xcd   : > { %v875_v42 = vsel %vm811_vm8, %v779_v41, %v843_v39  ;;  %v1547_v43 = vpop.f32.mrf.mxu3 }
  0xce   : > { %v911_v44 = vmul.f32 %v1466_v29, %v875_v42  ;;  %v674_v45 = vpop.f32.mrf.mxu2  ;;  %v471_v48 = vpop.f32.mrf.mxu0 }
  0xcf   : > { %v744_v47 = vadd.f32 %v674_v45, %v572_v4  ;;  %v574_v50 = vpop.f32.mrf.mxu1 }
  0xd0   : > { %v947_v49 = vadd.f32 %v1472_v31, %v911_v44  ;;  %v575_v53 = vadd.f32 %v574_v50, %v471_v48 }
  0xd1   : > { %v780_v51 = vadd.f32 %v1460_v23, %v744_v47 }
  0xd2   : > { %980 = vst.msk [vmem:[%s1480_s16 + $0x30] sm:$0xff] %vm973_vm2, %v947_v49 }
  0xd3   : > { %vm812_vm9 = vcmp.gt.f32.partialorder %v780_v51, 0.0  ;;  %v844_v52 = vmul.f32 0.01, %v780_v51 }
  0xd5   : > { %v876_v54 = vsel %vm812_vm9, %v780_v51, %v844_v52  ;;  %v1554_v55 = vpop.f32.mrf.mxu3 }
  0xd6   : > { %v912_v56 = vmul.f32 %v1466_v29, %v876_v54  ;;  %v677_v58 = vpop.f32.mrf.mxu2  ;;  %v473_v60 = vpop.f32.mrf.mxu0 }
  0xd7   : > { %v745_v59 = vadd.f32 %v677_v58, %v575_v53  ;;  %v576_v62 = vpop.f32.mrf.mxu1 }
  0xd8   : > { %v948_v61 = vadd.f32 %v1472_v31, %v912_v56  ;;  %v577_v2 = vadd.f32 %v576_v62, %v473_v60 }
  0xd9   : > { %v781_v63 = vadd.f32 %v1460_v23, %v745_v59 }
  0xda   : > { %981 = vst.msk [vmem:[%s1480_s16 + $0x38] sm:$0xff] %vm973_vm2, %v948_v61 }
  0xdb   : > { %vm813_vm10 = vcmp.gt.f32.partialorder %v781_v63, 0.0  ;;  %v845_v0 = vmul.f32 0.01, %v781_v63 }
  0xdd   : > { %v877_v1 = vsel %vm813_vm10, %v781_v63, %v845_v0  ;;  %v1561_v3 = vpop.f32.mrf.mxu3 }
  0xde   : > { %v913_v6 = vmul.f32 %v1466_v29, %v877_v1  ;;  %v679_v7 = vpop.f32.mrf.mxu2  ;;  %v476_v9 = vpop.f32.mrf.mxu0 }
  0xdf   : > { %v746_v8 = vadd.f32 %v679_v7, %v577_v2  ;;  %v579_v11 = vpop.f32.mrf.mxu1 }
  0xe0   : > { %v949_v10 = vadd.f32 %v1472_v31, %v913_v6  ;;  %v580_v15 = vadd.f32 %v579_v11, %v476_v9 }
  0xe1   : > { %v782_v12 = vadd.f32 %v1460_v23, %v746_v8 }
  0xe2   : > { %982 = vst.msk [vmem:[%s1480_s16 + $0x40] sm:$0xff] %vm973_vm2, %v949_v10 }
  0xe3   : > { %vm814_vm11 = vcmp.gt.f32.partialorder %v782_v12, 0.0  ;;  %v846_v14 = vmul.f32 0.01, %v782_v12 }
  0xe5   : > { %v878_v16 = vsel %vm814_vm11, %v782_v12, %v846_v14  ;;  %v1568_v18 = vpop.f32.mrf.mxu3 }
  0xe6   : > { %v914_v19 = vmul.f32 %v1466_v29, %v878_v16  ;;  %v682_v20 = vpop.f32.mrf.mxu2  ;;  %v478_v24 = vpop.f32.mrf.mxu0 }
  0xe7   : > { %v747_v21 = vadd.f32 %v682_v20, %v580_v15  ;;  %v581_v26 = vpop.f32.mrf.mxu1 }
  0xe8   : > { %v950_v25 = vadd.f32 %v1472_v31, %v914_v19  ;;  %v582_v32 = vadd.f32 %v581_v26, %v478_v24 }
  0xe9   : > { %v783_v27 = vadd.f32 %v1460_v23, %v747_v21 }
  0xea   : > { %983 = vst.msk [vmem:[%s1480_s16 + $0x48] sm:$0xff] %vm973_vm2, %v950_v25 }
  0xeb   : > { %vm815_vm12 = vcmp.gt.f32.partialorder %v783_v27, 0.0  ;;  %v847_v28 = vmul.f32 0.01, %v783_v27 }
  0xed   : > { %v879_v30 = vsel %vm815_vm12, %v783_v27, %v847_v28  ;;  %v1575_v35 = vpop.f32.mrf.mxu3 }
  0xee   : > { %v915_v36 = vmul.f32 %v1466_v29, %v879_v30  ;;  %v684_v37 = vpop.f32.mrf.mxu2  ;;  %v481_v38 = vpop.f32.mrf.mxu0 }
  0xef   : > { %v748_v13 = vadd.f32 %v684_v37, %v582_v32  ;;  %v584_v41 = vpop.f32.mrf.mxu1 }
  0xf0   : > { %v951_v40 = vadd.f32 %v1472_v31, %v915_v36  ;;  %v585_v4 = vadd.f32 %v584_v41, %v481_v38 }
  0xf1   : > { %v784_v39 = vadd.f32 %v1460_v23, %v748_v13 }
  0xf2   : > { %984 = vst.msk [vmem:[%s1480_s16 + $0x50] sm:$0xff] %vm973_vm2, %v951_v40  ;;  %v615_v40 = vadd.f32 %v1554_v55, %v1455_v22  ;;  %v617_v55 = vadd.f32 %v1561_v3, %v1474_v34 }
  0xf3   : > { %vm816_vm13 = vcmp.gt.f32.partialorder %v784_v39, 0.0  ;;  %v848_v42 = vmul.f32 0.01, %v784_v39 }
  0xf5   : > { %v880_v44 = vsel %vm816_vm13, %v784_v39, %v848_v42  ;;  %v1582_v45 = vpop.f32.mrf.mxu3 }
  0xf6   : > { %v916_v47 = vmul.f32 %v1466_v29, %v880_v44  ;;  %v687_v48 = vpop.f32.mrf.mxu2  ;;  %v483_v50 = vpop.f32.mrf.mxu0 }
  0xf7   : > { %v749_v49 = vadd.f32 %v687_v48, %v585_v4  ;;  %v586_v52 = vpop.f32.mrf.mxu1 }
  0xf8   : > { %v952_v51 = vadd.f32 %v1472_v31, %v916_v47  ;;  %v587_v58 = vadd.f32 %v586_v52, %v483_v50 }
  0xf9   : > { %v785_v53 = vadd.f32 %v1460_v23, %v749_v49 }
  0xfa   : > { %985 = vst.msk [vmem:[%s1480_s16 + $0x58] sm:$0xff] %vm973_vm2, %v952_v51 }
  0xfb   : > { %vm817_vm14 = vcmp.gt.f32.partialorder %v785_v53, 0.0  ;;  %v849_v54 = vmul.f32 0.01, %v785_v53 }
  0xfd   : > { %v881_v56 = vsel %vm817_vm14, %v785_v53, %v849_v54  ;;  %v1589_v59 = vpop.f32.mrf.mxu3 }
  0xfe   : > { %v917_v60 = vmul.f32 %v1466_v29, %v881_v56  ;;  %v689_v61 = vpop.f32.mrf.mxu2  ;;  %v486_v63 = vpop.f32.mrf.mxu0 }
  0xff   : > { %v750_v62 = vadd.f32 %v689_v61, %v587_v58  ;;  %v589_v1 = vpop.f32.mrf.mxu1 }
 0x100   : > { %v953_v0 = vadd.f32 %v1472_v31, %v917_v60  ;;  %v590_v7 = vadd.f32 %v589_v1, %v486_v63 }
 0x101   : > { %v786_v2 = vadd.f32 %v1460_v23, %v750_v62 }
 0x102   : > { %986 = vst.msk [vmem:[%s1480_s16 + $0x60] sm:$0xff] %vm973_vm2, %v953_v0 }
 0x103   : > { %vm818_vm15 = vcmp.gt.f32.partialorder %v786_v2, 0.0  ;;  %v850_v6 = vmul.f32 0.01, %v786_v2 }
 0x105   : > { %v882_v8 = vsel %vm818_vm15, %v786_v2, %v850_v6  ;;  %v1596_v9 = vpop.f32.mrf.mxu3 }
 0x106   : > { %v918_v10 = vmul.f32 %v1466_v29, %v882_v8  ;;  %v692_v11 = vpop.f32.mrf.mxu2  ;;  %v488_v14 = vpop.f32.mrf.mxu0 }
 0x107   : > { %v751_v12 = vadd.f32 %v692_v11, %v590_v7  ;;  %v591_v16 = vpop.f32.mrf.mxu1 }
 0x108   : > { %v954_v15 = vadd.f32 %v1472_v31, %v918_v10  ;;  %v592_v24 = vadd.f32 %v591_v16, %v488_v14  ;;  %v620_v14 = vadd.f32 %v1568_v18, %v1496_v46 }
 0x109   : > { %v787_v19 = vadd.f32 %v1460_v23, %v751_v12 }
 0x10a   : > { %987 = vst.msk [vmem:[%s1480_s16 + $0x68] sm:$0xff] %vm973_vm2, %v954_v15 }
 0x10b   : > { %vm819_vm0 = vcmp.gt.f32.partialorder %v787_v19, 0.0  ;;  %v851_v20 = vmul.f32 0.01, %v787_v19 }
 0x10d   : > { %v883_v21 = vsel %vm819_vm0, %v787_v19, %v851_v20  ;;  %v1603_v25 = vpop.f32.mrf.mxu3 }
 0x10e   : > { %v919_v26 = vmul.f32 %v1466_v29, %v883_v21  ;;  %v694_v27 = vpop.f32.mrf.mxu2  ;;  %v491_v30 = vpop.f32.mrf.mxu0 }
 0x10f   : > { %v752_v28 = vadd.f32 %v694_v27, %v592_v24  ;;  %v594_v36 = vpop.f32.mrf.mxu1 }
 0x110   : > { %v955_v32 = vadd.f32 %v1472_v31, %v919_v26  ;;  %v595_v38 = vadd.f32 %v594_v36, %v491_v30 }
 0x111   : > { %v788_v37 = vadd.f32 %v1460_v23, %v752_v28 }
 0x112   : > { %988 = vst.msk [vmem:[%s1480_s16 + $0x70] sm:$0xff] %vm973_vm2, %v955_v32 }
 0x113   : > { %vm820_vm1 = vcmp.gt.f32.partialorder %v788_v37, 0.0  ;;  %v852_v13 = vmul.f32 0.01, %v788_v37 }
 0x115   : > { %v884_v41 = vsel %vm820_vm1, %v788_v37, %v852_v13  ;;  %v717_v39 = vpop.f32.mrf.mxu3 }
 0x116   : > { %v920_v42 = vmul.f32 %v1466_v29, %v884_v41  ;;  %v697_v4 = vpop.f32.mrf.mxu2  ;;  %v761_v44 = vadd.f32 %v717_v39, %v615_v40  ;;  %v493_v48 = vpop.f32.mrf.mxu0 }
 0x117   : > { %v753_v47 = vadd.f32 %v697_v4, %v595_v38  ;;  %v596_v51 = vpop.f32.mrf.mxu1  ;;  %v622_v38 = vadd.f32 %v1575_v35, %v1503_v57 }
 0x118   : > { %v956_v49 = vadd.f32 %v1472_v31, %v920_v42  ;;  %v797_v50 = vadd.f32 %v1460_v23, %v761_v44  ;;  %v597_v60 = vadd.f32 %v596_v51, %v493_v48 }
 0x119   : > { %v789_v52 = vadd.f32 %v1460_v23, %v753_v47 }
 0x11a   : > { %989 = vst.msk [vmem:[%s1480_s16 + $0x78] sm:$0xff] %vm973_vm2, %v956_v49  ;;  %vm829_vm3 = vcmp.gt.f32.partialorder %v797_v50, 0.0  ;;  %v861_v53 = vmul.f32 0.01, %v797_v50 }
 0x11b   : > { %vm821_vm4 = vcmp.gt.f32.partialorder %v789_v52, 0.0  ;;  %v853_v22 = vmul.f32 0.01, %v789_v52 }
 0x11c   : > { %v893_v54 = vsel %vm829_vm3, %v797_v50, %v861_v53 }
 0x11d   : > { %v885_v56 = vsel %vm821_vm4, %v789_v52, %v853_v22  ;;  %v929_v58 = vmul.f32 %v1466_v29, %v893_v54  ;;  %v719_v61 = vpop.f32.mrf.mxu3 }
 0x11e   : > { %v921_v62 = vmul.f32 %v1466_v29, %v885_v56  ;;  %v699_v63 = vpop.f32.mrf.mxu2  ;;  %v762_v0 = vadd.f32 %v719_v61, %v617_v55  ;;  %v496_v6 = vpop.f32.mrf.mxu0  ;;  %v625_v56 = vadd.f32 %v1582_v45, %v1518_v5 }
 0x11f   : > { %v965_v1 = vadd.f32 %v1472_v31, %v929_v58  ;;  %v754_v2 = vadd.f32 %v699_v63, %v597_v60  ;;  %v599_v34 = vpop.f32.mrf.mxu1 }
 0x120   : > { %v957_v7 = vadd.f32 %v1472_v31, %v921_v62  ;;  %v798_v8 = vadd.f32 %v1460_v23, %v762_v0  ;;  %v600_v12 = vadd.f32 %v599_v34, %v496_v6 }
 0x121   : > { %998 = vst.msk [vmem:[%s1480_s16 + $0xc0] sm:$0xff] %vm973_vm2, %v965_v1  ;;  %v790_v3 = vadd.f32 %v1460_v23, %v754_v2 }
 0x122   : > { %990 = vst.msk [vmem:[%s1480_s16 + $0x80] sm:$0xff] %vm973_vm2, %v957_v7  ;;  %vm830_vm5 = vcmp.gt.f32.partialorder %v798_v8, 0.0  ;;  %v862_v10 = vmul.f32 0.01, %v798_v8 }
 0x123   : > { %vm822_vm6 = vcmp.gt.f32.partialorder %v790_v3, 0.0  ;;  %v854_v11 = vmul.f32 0.01, %v790_v3 }
 0x124   : > { %v894_v15 = vsel %vm830_vm5, %v798_v8, %v862_v10 }
 0x125   : > { %v886_v16 = vsel %vm822_vm6, %v790_v3, %v854_v11  ;;  %v930_v19 = vmul.f32 %v1466_v29, %v894_v15  ;;  %v722_v20 = vpop.f32.mrf.mxu3  ;;  %v627_v11 = vadd.f32 %v1589_v59, %v1525_v17 }
 0x126   : > { %v922_v21 = vmul.f32 %v1466_v29, %v886_v16  ;;  %v702_v24 = vpop.f32.mrf.mxu2  ;;  %v763_v26 = vadd.f32 %v722_v20, %v620_v14  ;;  %v498_v30 = vpop.f32.mrf.mxu0 }
 0x127   : > { %v966_v27 = vadd.f32 %v1472_v31, %v930_v19  ;;  %v755_v28 = vadd.f32 %v702_v24, %v600_v12  ;;  %v601_v37 = vpop.f32.mrf.mxu1 }
 0x128   : > { %v958_v32 = vadd.f32 %v1472_v31, %v922_v21  ;;  %v799_v36 = vadd.f32 %v1460_v23, %v763_v26  ;;  %v602_v42 = vadd.f32 %v601_v37, %v498_v30 }
 0x129   : > { %999 = vst.msk [vmem:[%s1480_s16 + $0xc8] sm:$0xff] %vm973_vm2, %v966_v27  ;;  %v791_v46 = vadd.f32 %v1460_v23, %v755_v28 }
 0x12a   : > { %991 = vst.msk [vmem:[%s1480_s16 + $0x88] sm:$0xff] %vm973_vm2, %v958_v32  ;;  %vm831_vm7 = vcmp.gt.f32.partialorder %v799_v36, 0.0  ;;  %v863_v18 = vmul.f32 0.01, %v799_v36 }
 0x12b   : > { %vm823_vm8 = vcmp.gt.f32.partialorder %v791_v46, 0.0  ;;  %v855_v13 = vmul.f32 0.01, %v791_v46 }
 0x12c   : > { %v895_v40 = vsel %vm831_vm7, %v799_v36, %v863_v18  ;;  %v630_v18 = vadd.f32 %v1596_v9, %v1540_v33 }
 0x12d   : > { %v887_v41 = vsel %vm823_vm8, %v791_v46, %v855_v13  ;;  %v931_v39 = vmul.f32 %v1466_v29, %v895_v40  ;;  %v724_v4 = vpop.f32.mrf.mxu3 }
 0x12e   : > { %v923_v44 = vmul.f32 %v1466_v29, %v887_v41  ;;  %v704_v47 = vpop.f32.mrf.mxu2  ;;  %v764_v48 = vadd.f32 %v724_v4, %v622_v38  ;;  %v501_v51 = vpop.f32.mrf.mxu0 }
 0x12f   : > { %v967_v49 = vadd.f32 %v1472_v31, %v931_v39  ;;  %v756_v50 = vadd.f32 %v704_v47, %v602_v42  ;;  %v604_v57 = vpop.f32.mrf.mxu1 }
 0x130   : > { %v959_v52 = vadd.f32 %v1472_v31, %v923_v44  ;;  %v800_v53 = vadd.f32 %v1460_v23, %v764_v48  ;;  %v605_v54 = vadd.f32 %v604_v57, %v501_v51 }
 0x131   : > { %1000 = vst.msk [vmem:[%s1480_s16 + $0xd0] sm:$0xff] %vm973_vm2, %v967_v49  ;;  %v792_v35 = vadd.f32 %v1460_v23, %v756_v50 }
 0x132   : > { %992 = vst.msk [vmem:[%s1480_s16 + $0x90] sm:$0xff] %vm973_vm2, %v959_v52  ;;  %vm832_vm9 = vcmp.gt.f32.partialorder %v800_v53, 0.0  ;;  %v864_v22 = vmul.f32 0.01, %v800_v53 }
 0x133   : > { %vm824_vm10 = vcmp.gt.f32.partialorder %v792_v35, 0.0  ;;  %v856_v55 = vmul.f32 0.01, %v792_v35 }
 0x134   : > { %v896_v58 = vsel %vm832_vm9, %v800_v53, %v864_v22  ;;  %v632_v53 = vadd.f32 %v1603_v25, %v1547_v43 }
 0x135   : > { %v888_v60 = vsel %vm824_vm10, %v792_v35, %v856_v55  ;;  %v932_v61 = vmul.f32 %v1466_v29, %v896_v58  ;;  %v727_v62 = vpop.f32.mrf.mxu3 }
 0x136   : > { %v924_v63 = vmul.f32 %v1466_v29, %v888_v60  ;;  %v707_v0 = vpop.f32.mrf.mxu2  ;;  %v765_v1 = vadd.f32 %v727_v62, %v625_v56  ;;  %v503_v7 = vpop.f32.mrf.mxu0 }
 0x137   : > { %v968_v2 = vadd.f32 %v1472_v31, %v932_v61  ;;  %v757_v6 = vadd.f32 %v707_v0, %v605_v54  ;;  %v606_v3 = vpop.f32.mrf.mxu1 }
 0x138   : > { %v960_v8 = vadd.f32 %v1472_v31, %v924_v63  ;;  %v801_v34 = vadd.f32 %v1460_v23, %v765_v1  ;;  %v607_v16 = vadd.f32 %v606_v3, %v503_v7 }
 0x139   : > { %1001 = vst.msk [vmem:[%s1480_s16 + $0xd8] sm:$0xff] %vm973_vm2, %v968_v2  ;;  %v793_v5 = vadd.f32 %v1460_v23, %v757_v6 }
 0x13a   : > { %993 = vst.msk [vmem:[%s1480_s16 + $0x98] sm:$0xff] %vm973_vm2, %v960_v8  ;;  %vm833_vm11 = vcmp.gt.f32.partialorder %v801_v34, 0.0  ;;  %v865_v45 = vmul.f32 0.01, %v801_v34 }
 0x13b   : > { %vm825_vm12 = vcmp.gt.f32.partialorder %v793_v5, 0.0  ;;  %v857_v10 = vmul.f32 0.01, %v793_v5 }
 0x13c   : > { %v897_v12 = vsel %vm833_vm11, %v801_v34, %v865_v45 }
 0x13d   : > { %v889_v14 = vsel %vm825_vm12, %v793_v5, %v857_v10  ;;  %v933_v15 = vmul.f32 %v1466_v29, %v897_v12  ;;  %v729_v19 = vpop.f32.mrf.mxu3 }
 0x13e   : > { %v925_v20 = vmul.f32 %v1466_v29, %v889_v14  ;;  %v709_v21 = vpop.f32.mrf.mxu2  ;;  %v766_v24 = vadd.f32 %v729_v19, %v627_v11  ;;  %v506_v32 = vpop.f32.mrf.mxu0 }
 0x13f   : > { %v969_v26 = vadd.f32 %v1472_v31, %v933_v15  ;;  %v758_v27 = vadd.f32 %v709_v21, %v607_v16  ;;  %v609_v17 = vpop.f32.mrf.mxu1 }
 0x140   : > { %v961_v28 = vadd.f32 %v1472_v31, %v925_v20  ;;  %v802_v30 = vadd.f32 %v1460_v23, %v766_v24  ;;  %v610_v46 = vadd.f32 %v609_v17, %v506_v32 }
 0x141   : > { %1002 = vst.msk [vmem:[%s1480_s16 + $0xe0] sm:$0xff] %vm973_vm2, %v969_v26  ;;  %v794_v59 = vadd.f32 %v1460_v23, %v758_v27 }
 0x142   : > { %994 = vst.msk [vmem:[%s1480_s16 + $0xa0] sm:$0xff] %vm973_vm2, %v961_v28  ;;  %vm834_vm13 = vcmp.gt.f32.partialorder %v802_v30, 0.0  ;;  %v866_v36 = vmul.f32 0.01, %v802_v30 }
 0x143   : > { %vm826_vm14 = vcmp.gt.f32.partialorder %v794_v59, 0.0  ;;  %v858_v37 = vmul.f32 0.01, %v794_v59 }
 0x144   : > { %v898_v13 = vsel %vm834_vm13, %v802_v30, %v866_v36 }
 0x145   : > { %v890_v38 = vsel %vm826_vm14, %v794_v59, %v858_v37  ;;  %v934_v40 = vmul.f32 %v1466_v29, %v898_v13  ;;  %v732_v41 = vpop.f32.mrf.mxu3 }
 0x146   : > { %v926_v39 = vmul.f32 %v1466_v29, %v890_v38  ;;  %v712_v42 = vpop.f32.mrf.mxu2  ;;  %v767_v4 = vadd.f32 %v732_v41, %v630_v18  ;;  %v508_v50 = vpop.f32.mrf.mxu0 }
 0x147   : > { %v970_v44 = vadd.f32 %v1472_v31, %v934_v40  ;;  %v759_v47 = vadd.f32 %v712_v42, %v610_v46  ;;  %v611_v51 = vpop.f32.mrf.mxu1 }
 0x148   : > { %v962_v48 = vadd.f32 %v1472_v31, %v926_v39  ;;  %v803_v49 = vadd.f32 %v1460_v23, %v767_v4  ;;  %v612_v55 = vadd.f32 %v611_v51, %v508_v50 }
 0x149   : > { %1003 = vst.msk [vmem:[%s1480_s16 + $0xe8] sm:$0xff] %vm973_vm2, %v970_v44  ;;  %v795_v33 = vadd.f32 %v1460_v23, %v759_v47 }
 0x14a   : > { %995 = vst.msk [vmem:[%s1480_s16 + $0xa8] sm:$0xff] %vm973_vm2, %v962_v48  ;;  %vm835_vm15 = vcmp.gt.f32.partialorder %v803_v49, 0.0  ;;  %v867_v9 = vmul.f32 0.01, %v803_v49 }
 0x14b   : > { %vm827_vm0 = vcmp.gt.f32.partialorder %v795_v33, 0.0  ;;  %v859_v52 = vmul.f32 0.01, %v795_v33 }
 0x14c   : > { %v899_v57 = vsel %vm835_vm15, %v803_v49, %v867_v9 }
 0x14d   : > { %v891_v35 = vsel %vm827_vm0, %v795_v33, %v859_v52  ;;  %v935_v22 = vmul.f32 %v1466_v29, %v899_v57  ;;  %v734_v54 = vpop.f32.mrf.mxu3 }
 0x14e   : > { %v927_v56 = vmul.f32 %v1466_v29, %v891_v35  ;;  %v714_v58 = vpop.f32.mrf.mxu2  ;;  %v768_v60 = vadd.f32 %v734_v54, %v632_v53 }
 0x14f   : > { %v971_v61 = vadd.f32 %v1472_v31, %v935_v22  ;;  %v760_v62 = vadd.f32 %v714_v58, %v612_v55 }
 0x150   : > { %v963_v63 = vadd.f32 %v1472_v31, %v927_v56  ;;  %v804_v0 = vadd.f32 %v1460_v23, %v768_v60 }
 0x151   : > { %1004 = vst.msk [vmem:[%s1480_s16 + $0xf0] sm:$0xff] %vm973_vm2, %v971_v61  ;;  %v796_v43 = vadd.f32 %v1460_v23, %v760_v62 }
 0x152   : > { %996 = vst.msk [vmem:[%s1480_s16 + $0xb0] sm:$0xff] %vm973_vm2, %v963_v63  ;;  %vm836_vm1 = vcmp.gt.f32.partialorder %v804_v0, 0.0  ;;  %v868_v25 = vmul.f32 0.01, %v804_v0 }
 0x153   : > { %vm828_vm3 = vcmp.gt.f32.partialorder %v796_v43, 0.0  ;;  %v860_v1 = vmul.f32 0.01, %v796_v43 }
 0x154   : > { %v900_v2 = vsel %vm836_vm1, %v804_v0, %v868_v25 }
 0x155   : > { %v892_v6 = vsel %vm828_vm3, %v796_v43, %v860_v1  ;;  %v936_v7 = vmul.f32 %v1466_v29, %v900_v2 }
 0x156   : > { %v928_v8 = vmul.f32 %v1466_v29, %v892_v6 }
 0x157   : > { %v972_v34 = vadd.f32 %v1472_v31, %v936_v7 }
 0x158   : > { %v964_v3 = vadd.f32 %v1472_v31, %v928_v8 }
 0x159   : > { %1005 = vst.msk [vmem:[%s1480_s16 + $0xf8] sm:$0xff] %vm973_vm2, %v972_v34 }
 0x15a   : > { %997 = vst.msk [vmem:[%s1480_s16 + $0xb8] sm:$0xff] %vm973_vm2, %v964_v3 }
 0x15b PF: > { %s15_s20 = sadd.s32 1, %s1319_s20   ;;  %s1725_s18 = smov %s1315_s19 }
 0x15c   : > { %p12_p5 = scmp.ge.s32.totalorder %s15_s20, 4   ;;  %s1726_s19 = smov %s1728_s21 }
 0x15e   :  { %14 = sbr.rel (!%p12_p5) target bundleno = 2 (0x2), region = 70 }

// kernel: conv2d_module.2
= control target key start
LH: loop header
LB: loop body
LE: loop exit
PB: predicated region body
PF: predicated region fallthrough
CT: control target
= control target key end

     0   :  { %s1308_s12 = smov 0   ;;  %s1310_s13 = smov 0   ;;  %s1783_s0 = inlined_call_operand.vmem [shape: bf16[2,1,288,16], index: 0, kind: input, shape index: {}]   ;;  %s1784_s1 = inlined_call_operand.vmem [shape: bf16[3,16,128], index: 1, kind: input, shape index: {}]   ;;  %s1785_s2 = inlined_call_operand.vmem [shape: f32[1,128], index: 2, kind: input, shape index: {}]   ;;  %s1786_s3 = inlined_call_operand.vmem [shape: f32[2,1,2,128], index: 3, kind: output, shape index: {}]  }
   0x1   :  { %s1312_s14 = smov 0  }
   0x2 LB: > { %s25_s15 = sadd.s32 1, %s1281_s13  ;;  %p1073_p0 = scmp.ge.s32.totalorder %s1285_s14, 1  ;;  %s1285_s14 = sphi %s1312_s14, %s13_s14   ;;  %s1281_s13 = sphi %s1310_s13, %s1788_s13   ;;  %s1277_s12 = sphi %s1308_s12, %s1787_s12  }
   0x3   : > { %p27_p1 = scmp.ge.s32.totalorder %s25_s15, 2  ;;  %p157_p2 = scmp.lt.s32.totalorder %s1285_s14, 3 }
   0x5   : > { %s1790_s15 = smov (%p27_p1, %s25_s15), 0  ;;  %p158_p3 = pnand %p1073_p0, %p157_p2 }
   0x6   : > { %p187_p4 = scmp.lt.s32.totalorder (!%p158_p3), %s1277_s12, 1 }
   0x7   : > { %161 = sbr.rel (%p158_p3) target bundleno = 454 (0x1c6), region = 32 }
   0xc   : > { %v1229_v0 = vld [vmem:[%s1784_s1 + $0x8] sm:$0xff]  ;;  %v1228_v1 = vld [vmem:[%s1784_s1] sm:$0xff]  ;;  %v1230_v2 = vld [vmem:[%s1784_s1 + $0x10] sm:$0xff]  ;;  %s1792_s12 = smov (!%p187_p4, %s1277_s12), 1  ;;  %vm332_vm0 = vcmask 130048  }
   0xd   : > { %388 = vmatpush.bf16.msra.mxu0 %v1229_v0  ;;  %1231 = vmatpush.bf16.msra.mxu3 %v1229_v0  ;;  %s1234_s22 = smul.u32 144, %s1792_s12  ;;  %s1075_s28 = sshll.u32 %s1792_s12, 1 }
   0xe   : > { %491 = vmatpush.bf16.msra.mxu1 %v1228_v1  ;;  %594 = vmatpush.bf16.msra.mxu2 %v1230_v2  ;;  %s202_s4 = scalar_lea.vmem %s1786_s3, %s1075_s28 }
   0xf   : > { %s1341_s25 = scalar_lea.vmem %s1783_s0, %s1234_s22 }
  0x10   : > { %v1211_v3 = vld [vmem:[%s1341_s25 + $0x8] sm:$0xff]  ;;  %v1210_v5 = vld [vmem:[%s1341_s25] sm:$0xff]  ;;  %v1212_v6 = vld [vmem:[%s1341_s25 + $0x10] sm:$0xff] }
  0x11   : > { %1232 = vmatpush.bf16.msrb.mxu3 %v1228_v1  ;;  %v1345_v4 = vld [vmem:[%s1341_s25 + $0x68] sm:$0xff]  ;;  %1144 = vmatmul.msk.bf16.vlgmr.msra.gmra.mxu0 %vm332_vm0, %v1211_v3  ;;  %v1224_v7 = vld [vmem:[%s1341_s25 + $0x70] sm:$0xff]  ;;  %v1213_v8 = vld [vmem:[%s1341_s25 + $0x18] sm:$0xff] }
  0x12   : > { %1156 = vmatmul.msk.bf16.vlgmr.msra.gmra.mxu3 %vm332_vm0, %v1345_v4  ;;  %1168 = vmatmul.msk.bf16.vlgmr.msra.gmra.mxu1 %vm332_vm0, %v1210_v5  ;;  %v1225_v9 = vld [vmem:[%s1341_s25 + $0x78] sm:$0xff]  ;;  %v1214_v10 = vld [vmem:[%s1341_s25 + $0x20] sm:$0xff]  ;;  %v1215_v12 = vld [vmem:[%s1341_s25 + $0x28] sm:$0xff] }
  0x13   : > { %1192 = vmatmul.msk.bf16.vlgmr.msra.gmra.mxu2 %vm332_vm0, %v1212_v6  ;;  %v1367_v11 = vld [vmem:[%s1341_s25 + $0x80] sm:$0xff]  ;;  %v1216_v14 = vld [vmem:[%s1341_s25 + $0x30] sm:$0xff]  ;;  %v1217_v15 = vld [vmem:[%s1341_s25 + $0x38] sm:$0xff] }
  0x14   : > { %v1376_v13 = vld [vmem:[%s1341_s25 + $0x60] sm:$0xff]  ;;  %v1219_v17 = vld [vmem:[%s1341_s25 + $0x48] sm:$0xff]  ;;  %v1220_v19 = vld [vmem:[%s1341_s25 + $0x50] sm:$0xff] }
  0x15   : > { %1233 = vmatpush.bf16.msra.mxu3 %v1230_v2  ;;  %v1218_v16 = vld [vmem:[%s1341_s25 + $0x40] sm:$0xff]  ;;  %v1221_v32 = vld [vmem:[%s1341_s25 + $0x58] sm:$0xff]  ;;  %v1227_v55 = vld [vmem:[%s1341_s25 + $0x88] sm:$0xff] }
  0x21   : > { %1145 = vmatmul.msk.bf16.gmra.mxu0 %vm332_vm0, %v1212_v6 }
  0x22   : > { %1157 = vmatmul.msk.bf16.gmra.mxu3 %vm332_vm0, %v1224_v7  ;;  %1169 = vmatmul.msk.bf16.gmra.mxu1 %vm332_vm0, %v1211_v3 }
  0x23   : > { %1193 = vmatmul.msk.bf16.gmra.mxu2 %vm332_vm0, %v1213_v8 }
  0x31   : > { %1146 = vmatmul.msk.bf16.gmra.mxu0 %vm332_vm0, %v1213_v8 }
  0x32   : > { %1158 = vmatmul.msk.bf16.gmra.mxu3 %vm332_vm0, %v1225_v9  ;;  %1170 = vmatmul.msk.bf16.gmra.mxu1 %vm332_vm0, %v1212_v6 }
  0x33   : > { %1194 = vmatmul.msk.bf16.gmra.mxu2 %vm332_vm0, %v1214_v10 }
  0x41   : > { %1147 = vmatmul.msk.bf16.gmra.mxu0 %vm332_vm0, %v1214_v10 }
  0x42   : > { %1159 = vmatmul.msk.bf16.gmra.mxu3 %vm332_vm0, %v1367_v11  ;;  %1171 = vmatmul.msk.bf16.gmra.mxu1 %vm332_vm0, %v1213_v8 }
  0x43   : > { %1195 = vmatmul.msk.bf16.gmra.mxu2 %vm332_vm0, %v1215_v12 }
  0x51   : > { %1148 = vmatmul.msk.bf16.gmra.mxu0 %vm332_vm0, %v1215_v12 }
  0x52   : > { %1180 = vmatmul.msk.bf16.vlgmr.msrb.gmra.mxu3 %vm332_vm0, %v1376_v13  ;;  %1172 = vmatmul.msk.bf16.gmra.mxu1 %vm332_vm0, %v1214_v10 }
  0x53   : > { %1196 = vmatmul.msk.bf16.gmra.mxu2 %vm332_vm0, %v1216_v14 }
  0x61   : > { %1149 = vmatmul.msk.bf16.gmra.mxu0 %vm332_vm0, %v1216_v14 }
  0x62   : > { %1181 = vmatmul.msk.bf16.gmra.mxu3 %vm332_vm0, %v1345_v4  ;;  %1173 = vmatmul.msk.bf16.gmra.mxu1 %vm332_vm0, %v1215_v12 }
  0x63   : > { %1197 = vmatmul.msk.bf16.gmra.mxu2 %vm332_vm0, %v1217_v15 }
  0x71   : > { %1150 = vmatmul.msk.bf16.gmra.mxu0 %vm332_vm0, %v1217_v15 }
  0x72   : > { %1182 = vmatmul.msk.bf16.gmra.mxu3 %vm332_vm0, %v1224_v7  ;;  %1174 = vmatmul.msk.bf16.gmra.mxu1 %vm332_vm0, %v1216_v14 }
  0x73   : > { %1198 = vmatmul.msk.bf16.gmra.mxu2 %vm332_vm0, %v1218_v16 }
  0x81   : > { %1151 = vmatmul.msk.bf16.gmra.mxu0 %vm332_vm0, %v1218_v16 }
  0x82   : > { %1183 = vmatmul.msk.bf16.gmra.mxu3 %vm332_vm0, %v1225_v9  ;;  %1175 = vmatmul.msk.bf16.gmra.mxu1 %vm332_vm0, %v1217_v15 }
  0x83   : > { %1199 = vmatmul.msk.bf16.gmra.mxu2 %vm332_vm0, %v1219_v17 }
  0x8e   : > { %v390_v18 = vpop.f32.mrf.mxu0 }
  0x8f   : > { %v493_v20 = vpop.f32.mrf.mxu1 }
  0x90   : > { %v494_v21 = vadd.f32 %v493_v20, %v390_v18 }
  0x91   : > { %1152 = vmatmul.msk.bf16.gmra.mxu0 %vm332_vm0, %v1219_v17 }
  0x92   : > { %1204 = vmatmul.msk.bf16.vlgmr.msra.gmra.mxu3 %vm332_vm0, %v1224_v7  ;;  %1176 = vmatmul.msk.bf16.gmra.mxu1 %vm332_vm0, %v1218_v16 }
  0x93   : > { %1200 = vmatmul.msk.bf16.gmra.mxu2 %vm332_vm0, %v1220_v19 }
  0x95   : > { %v1405_v22 = vpop.f32.mrf.mxu3 }
  0x96   : > { %v596_v23 = vpop.f32.mrf.mxu2  ;;  %v392_v25 = vpop.f32.mrf.mxu0 }
  0x97   : > { %v1407_v24 = vadd.f32 %v596_v23, %v494_v21  ;;  %v495_v26 = vpop.f32.mrf.mxu1 }
  0x98   : > { %v496_v27 = vadd.f32 %v495_v26, %v392_v25 }
  0x9d   : > { %v1409_v28 = vpop.f32.mrf.mxu3 }
  0x9e   : > { %v598_v29 = vpop.f32.mrf.mxu2  ;;  %v395_v31 = vpop.f32.mrf.mxu0 }
  0x9f   : > { %v1411_v30 = vadd.f32 %v598_v29, %v496_v27  ;;  %v498_v33 = vpop.f32.mrf.mxu1 }
  0xa0   : > { %v499_v34 = vadd.f32 %v498_v33, %v395_v31 }
  0xa1   : > { %1153 = vmatmul.msk.bf16.gmra.mxu0 %vm332_vm0, %v1220_v19 }
  0xa2   : > { %1205 = vmatmul.msk.bf16.gmra.mxu3 %vm332_vm0, %v1225_v9  ;;  %1177 = vmatmul.msk.bf16.gmra.mxu1 %vm332_vm0, %v1219_v17 }
  0xa3   : > { %1201 = vmatmul.msk.bf16.gmra.mxu2 %vm332_vm0, %v1221_v32 }
  0xa5   : > { %v455_v35 = vpop.f32.mrf.mxu3 }
  0xa6   : > { %v601_v36 = vpop.f32.mrf.mxu2  ;;  %v397_v38 = vpop.f32.mrf.mxu0 }
  0xa7   : > { %v1418_v37 = vadd.f32 %v601_v36, %v499_v34  ;;  %v500_v39 = vpop.f32.mrf.mxu1 }
  0xa8   : > { %v501_v40 = vadd.f32 %v500_v39, %v397_v38 }
  0xad   : > { %v457_v41 = vpop.f32.mrf.mxu3 }
  0xae   : > { %v603_v42 = vpop.f32.mrf.mxu2  ;;  %v400_v44 = vpop.f32.mrf.mxu0 }
  0xaf   : > { %v1420_v43 = vadd.f32 %v603_v42, %v501_v40  ;;  %v503_v45 = vpop.f32.mrf.mxu1 }
  0xb0   : > { %v504_v46 = vadd.f32 %v503_v45, %v400_v44 }
  0xb1   : > { %1154 = vmatmul.msk.bf16.gmra.mxu0 %vm332_vm0, %v1221_v32 }
  0xb2   : > { %1206 = vmatmul.msk.bf16.gmra.mxu3 %vm332_vm0, %v1367_v11  ;;  %1178 = vmatmul.msk.bf16.gmra.mxu1 %vm332_vm0, %v1220_v19 }
  0xb3   : > { %1202 = vmatmul.msk.bf16.gmra.mxu2 %vm332_vm0, %v1376_v13 }
  0xb5   : > { %v460_v47 = vpop.f32.mrf.mxu3 }
  0xb6   : > { %v606_v48 = vpop.f32.mrf.mxu2  ;;  %v402_v50 = vpop.f32.mrf.mxu0 }
  0xb7   : > { %v1428_v49 = vadd.f32 %v606_v48, %v504_v46  ;;  %v505_v51 = vpop.f32.mrf.mxu1 }
  0xb8   : > { %v506_v52 = vadd.f32 %v505_v51, %v402_v50 }
  0xbd   : > { %v462_v53 = vpop.f32.mrf.mxu3 }
  0xbe   : > { %v608_v54 = vpop.f32.mrf.mxu2  ;;  %v405_v57 = vpop.f32.mrf.mxu0 }
  0xbf   : > { %v1431_v56 = vadd.f32 %v608_v54, %v506_v52  ;;  %v508_v58 = vpop.f32.mrf.mxu1 }
  0xc0   : > { %v509_v59 = vadd.f32 %v508_v58, %v405_v57 }
  0xc1   : > { %1155 = vmatmul.msk.bf16.gmra.mxu0 %vm332_vm0, %v1376_v13 }
  0xc2   : > { %1207 = vmatmul.msk.bf16.gmra.mxu3 %vm332_vm0, %v1227_v55  ;;  %1179 = vmatmul.msk.bf16.gmra.mxu1 %vm332_vm0, %v1221_v32 }
  0xc3   : > { %1203 = vmatmul.msk.bf16.gmra.mxu2 %vm332_vm0, %v1345_v4 }
  0xc5   : > { %v465_v60 = vpop.f32.mrf.mxu3 }
  0xc6   : > { %v611_v61 = vpop.f32.mrf.mxu2  ;;  %v407_v63 = vpop.f32.mrf.mxu0 }
  0xc7   : > { %v1439_v62 = vadd.f32 %v611_v61, %v509_v59  ;;  %v510_v0 = vpop.f32.mrf.mxu1 }
  0xc8   : > { %v511_v1 = vadd.f32 %v510_v0, %v407_v63 }
  0xcd   : > { %v1441_v2 = vpop.f32.mrf.mxu3 }
  0xce   : > { %v613_v3 = vpop.f32.mrf.mxu2  ;;  %v410_v6 = vpop.f32.mrf.mxu0 }
  0xcf   : > { %v1443_v5 = vadd.f32 %v613_v3, %v511_v1  ;;  %v513_v7 = vpop.f32.mrf.mxu1 }
  0xd0   : > { %v514_v8 = vadd.f32 %v513_v7, %v410_v6  ;;  %v1506_v6 = vld [vmem:[%s1785_s2] ss:$0 sm:$0xff] }
  0xd1   : > { %v713_v7 = vadd.f32 %v1506_v6, %v1411_v30 }
  0xd3   : > { %vm745_vm1 = vcmp.gt.f32.partialorder %v713_v7, 0.0 }
  0xd5   : > { %v553_v9 = vpop.f32.mrf.mxu3 }
  0xd6   : > { %v1446_v10 = vadd.f32 %v553_v9, %v1405_v22  ;;  %v616_v4 = vpop.f32.mrf.mxu2  ;;  %v412_v12 = vpop.f32.mrf.mxu0  ;;  %v712_v9 = vadd.f32 %v1506_v6, %v1407_v24 }
  0xd7   : > { %v1448_v11 = vadd.f32 %v616_v4, %v514_v8  ;;  %v515_v13 = vpop.f32.mrf.mxu1  ;;  %v714_v4 = vadd.f32 %v1506_v6, %v1418_v37 }
  0xd8   : > { %v516_v14 = vadd.f32 %v515_v13, %v412_v12  ;;  %v776_v30 = vmul.f32 0.01, %v712_v9  ;;  %vm744_vm2 = vcmp.gt.f32.partialorder %v712_v9, 0.0 }
  0xd9   : > { %vm746_vm3 = vcmp.gt.f32.partialorder %v714_v4, 0.0 }
  0xdd   : > { %v555_v15 = vpop.f32.mrf.mxu3 }
  0xde   : > { %v1451_v16 = vadd.f32 %v555_v15, %v1409_v28  ;;  %v618_v17 = vpop.f32.mrf.mxu2  ;;  %v415_v19 = vpop.f32.mrf.mxu0  ;;  %v715_v15 = vadd.f32 %v1506_v6, %v1420_v43  ;;  %v1532_v43 = vsel %vm744_vm2, %v712_v9, %v776_v30 }
  0xdf   : > { %v1453_v18 = vadd.f32 %v618_v17, %v516_v14  ;;  %v518_v20 = vpop.f32.mrf.mxu1  ;;  %v777_v14 = vmul.f32 0.01, %v713_v7 }
  0xe0   : > { %v519_v21 = vadd.f32 %v518_v20, %v415_v19  ;;  %v778_v19 = vmul.f32 0.01, %v714_v4  ;;  %v716_v20 = vadd.f32 %v1506_v6, %v1428_v49  ;;  %v779_v37 = vmul.f32 0.01, %v715_v15 }
  0xe1   : > { %v1526_v24 = vsel %vm745_vm1, %v713_v7, %v777_v14  ;;  %vm747_vm4 = vcmp.gt.f32.partialorder %v715_v15, 0.0 }
  0xe2   : > { %vm748_vm5 = vcmp.gt.f32.partialorder %v716_v20, 0.0 }
  0xe5   : > { %v558_v23 = vpop.f32.mrf.mxu3 }
  0xe6   : > { %v1455_v25 = vadd.f32 %v558_v23, %v455_v35  ;;  %v621_v22 = vpop.f32.mrf.mxu2  ;;  %v417_v27 = vpop.f32.mrf.mxu0 }
  0xe7   : > { %v1457_v26 = vadd.f32 %v621_v22, %v519_v21  ;;  %v520_v29 = vpop.f32.mrf.mxu1  ;;  %v717_v21 = vadd.f32 %v1506_v6, %v1431_v56  ;;  %v1534_v22 = vsel %vm746_vm3, %v714_v4, %v778_v19  ;;  %v1544_v56 = vsel %vm747_vm4, %v715_v15, %v779_v37 }
  0xe8   : > { %v521_v31 = vadd.f32 %v520_v29, %v417_v27  ;;  %v780_v27 = vmul.f32 0.01, %v716_v20  ;;  %v718_v29 = vadd.f32 %v1506_v6, %v1439_v62 }
  0xe9   : > { %vm749_vm6 = vcmp.gt.f32.partialorder %v717_v21, 0.0 }
  0xea   : > { %v1551_v62 = vsel %vm748_vm5, %v716_v20, %v780_v27  ;;  %vm750_vm7 = vcmp.gt.f32.partialorder %v718_v29, 0.0 }
  0xed   : > { %v560_v32 = vpop.f32.mrf.mxu3 }
  0xee   : > { %v1459_v33 = vadd.f32 %v560_v32, %v457_v41  ;;  %v623_v28 = vpop.f32.mrf.mxu2  ;;  %v420_v36 = vpop.f32.mrf.mxu0 }
  0xef   : > { %v1461_v34 = vadd.f32 %v623_v28, %v521_v31  ;;  %v523_v38 = vpop.f32.mrf.mxu1  ;;  %v840_v31 = vadd.f32 %v1526_v24, %v1532_v43  ;;  %v781_v28 = vmul.f32 0.01, %v717_v21 }
  0xf0   : > { %v524_v39 = vadd.f32 %v523_v38, %v420_v36  ;;  %v719_v36 = vadd.f32 %v1506_v6, %v1443_v5 }
  0xf1   : > { %v1558_v7 = vsel %vm749_vm6, %v717_v21, %v781_v28 }
  0xf2   : > { %v783_v5 = vmul.f32 0.01, %v719_v36  ;;  %vm751_vm8 = vcmp.gt.f32.partialorder %v719_v36, 0.0 }
  0xf4   : > { %v1566_v37 = vsel %vm751_vm8, %v719_v36, %v783_v5  ;;  %v723_v36 = vadd.f32 %v1506_v6, %v1461_v34 }
  0xf5   : > { %v563_v40 = vpop.f32.mrf.mxu3 }
  0xf6   : > { %v1463_v42 = vadd.f32 %v563_v40, %v460_v47  ;;  %v626_v35 = vpop.f32.mrf.mxu2  ;;  %v1467_v45 = vpop.f32.mrf.mxu0  ;;  %v782_v40 = vmul.f32 0.01, %v718_v29  ;;  %v787_v5 = vmul.f32 0.01, %v723_v36  ;;  %vm755_vm12 = vcmp.gt.f32.partialorder %v723_v36, 0.0 }
  0xf7   : > { %v1465_v44 = vadd.f32 %v626_v35, %v524_v39  ;;  %v1469_v46 = vpop.f32.mrf.mxu1  ;;  %v841_v39 = vadd.f32 %v840_v31, %v1534_v22  ;;  %v720_v35 = vadd.f32 %v1506_v6, %v1448_v11 }
  0xf8   : > { %v1561_v4 = vsel %vm750_vm7, %v718_v29, %v782_v40  ;;  %v526_v31 = vadd.f32 %v1469_v46, %v1467_v45 }
  0xf9   : > { %v784_v14 = vmul.f32 0.01, %v720_v35  ;;  %vm752_vm9 = vcmp.gt.f32.partialorder %v720_v35, 0.0 }
  0xfb   : > { %v1575_v28 = vsel %vm752_vm9, %v720_v35, %v784_v14 }
  0xfd   : > { %v565_v48 = vpop.f32.mrf.mxu3 }
  0xfe   : > { %v1471_v50 = vadd.f32 %v565_v48, %v462_v53  ;;  %v1473_v41 = vpop.f32.mrf.mxu2  ;;  %v1475_v51 = vpop.f32.mrf.mxu0  ;;  %v842_v48 = vadd.f32 %v841_v39, %v1544_v56 }
  0xff   : > { %v1477_v52 = vpop.f32.mrf.mxu1 }
 0x100   : > { %v843_v9 = vadd.f32 %v842_v48, %v1551_v62  ;;  %v529_v21 = vadd.f32 %v1477_v52, %v1475_v51  ;;  %v724_v51 = vadd.f32 %v1506_v6, %v1465_v44 }
 0x102   : > { %v844_v11 = vadd.f32 %v843_v9, %v1558_v7  ;;  %vm756_vm13 = vcmp.gt.f32.partialorder %v724_v51, 0.0 }
 0x104   : > { %v845_v29 = vadd.f32 %v844_v11, %v1561_v4 }
 0x105   : > { %v568_v54 = vpop.f32.mrf.mxu3 }
 0x106   : > { %v1479_v55 = vadd.f32 %v568_v54, %v465_v60  ;;  %v1481_v47 = vpop.f32.mrf.mxu2  ;;  %v1483_v57 = vpop.f32.mrf.mxu0  ;;  %v721_v54 = vadd.f32 %v1506_v6, %v1453_v18  ;;  %v722_v18 = vadd.f32 %v1506_v6, %v1457_v26  ;;  %v846_v39 = vadd.f32 %v845_v29, %v1566_v37 }
 0x107   : > { %v1485_v58 = vpop.f32.mrf.mxu1  ;;  %v689_v26 = vadd.f32 %v1473_v41, %v526_v31  ;;  %v690_v52 = vadd.f32 %v1481_v47, %v529_v21  ;;  %v788_v47 = vmul.f32 0.01, %v724_v51  ;;  %v1606_v21 = vsel %vm755_vm12, %v723_v36, %v787_v5 }
 0x108   : > { %v785_v19 = vmul.f32 0.01, %v721_v54  ;;  %vm753_vm10 = vcmp.gt.f32.partialorder %v721_v54, 0.0  ;;  %v786_v48 = vmul.f32 0.01, %v722_v18  ;;  %v531_v45 = vadd.f32 %v1485_v58, %v1483_v57 }
 0x109   : > { %v847_v46 = vadd.f32 %v846_v39, %v1575_v28  ;;  %vm754_vm11 = vcmp.gt.f32.partialorder %v722_v18, 0.0  ;;  %v725_v9 = vadd.f32 %v1506_v6, %v689_v26  ;;  %v726_v57 = vadd.f32 %v1506_v6, %v690_v52 }
 0x10a   : > { %v1578_v40 = vsel %vm753_vm10, %v721_v54, %v785_v19  ;;  %v1594_v14 = vsel %vm754_vm11, %v722_v18, %v786_v48  ;;  %v1609_v39 = vsel %vm756_vm13, %v724_v51, %v788_v47 }
 0x10b   : > { %v848_v41 = vadd.f32 %v847_v46, %v1578_v40  ;;  %v789_v29 = vmul.f32 0.01, %v725_v9  ;;  %vm757_vm14 = vcmp.gt.f32.partialorder %v725_v9, 0.0  ;;  %vm758_vm15 = vcmp.gt.f32.partialorder %v726_v57, 0.0 }
 0x10d   : > { %v1487_v59 = vpop.f32.mrf.mxu3  ;;  %v849_v18 = vadd.f32 %v848_v41, %v1594_v14  ;;  %v1616_v52 = vsel %vm757_vm14, %v725_v9, %v789_v29 }
 0x10e   : > { %v1489_v61 = vpop.f32.mrf.mxu2  ;;  %v1491_v53 = vpop.f32.mrf.mxu0 }
 0x10f   : > { %v1493_v63 = vpop.f32.mrf.mxu1  ;;  %v691_v54 = vadd.f32 %v1489_v61, %v531_v45 }
 0x110   : > { %v534_v35 = vadd.f32 %v1493_v63, %v1491_v53 }
 0x111   : > { %v727_v19 = vadd.f32 %v1506_v6, %v691_v54 }
 0x113   : > { %v791_v36 = vmul.f32 0.01, %v727_v19  ;;  %vm759_vm0 = vcmp.gt.f32.partialorder %v727_v19, 0.0 }
 0x115   : > { %v1495_v0 = vpop.f32.mrf.mxu3  ;;  %v1624_v41 = vsel %vm759_vm0, %v727_v19, %v791_v36 }
 0x116   : > { %v1497_v1 = vpop.f32.mrf.mxu2  ;;  %v1499_v60 = vpop.f32.mrf.mxu0 }
 0x117   : > { %v1501_v3 = vpop.f32.mrf.mxu1  ;;  %v692_v53 = vadd.f32 %v1497_v1, %v534_v35  ;;  %v790_v1 = vmul.f32 0.01, %v726_v57 }
 0x118   : > { %v536_v61 = vadd.f32 %v1501_v3, %v1499_v60 }
 0x119   : > { %v728_v26 = vadd.f32 %v1506_v6, %v692_v53  ;;  %v1620_v46 = vsel %vm758_vm15, %v726_v57, %v790_v1 }
 0x11b   : > { %v792_v54 = vmul.f32 0.01, %v728_v26  ;;  %vm760_vm1 = vcmp.gt.f32.partialorder %v728_v26, 0.0 }
 0x11d   : > { %v1510_v8 = vpop.f32.mrf.mxu3 }
 0x11e   : > { %v1516_v12 = vpop.f32.mrf.mxu2  ;;  %v1518_v13 = vpop.f32.mrf.mxu0 }
 0x11f   : > { %v1522_v17 = vpop.f32.mrf.mxu1  ;;  %v693_v31 = vadd.f32 %v1516_v12, %v536_v61  ;;  %v1628_v61 = vsel %vm760_vm1, %v728_v26, %v792_v54 }
 0x120   : > { %v539_v63 = vadd.f32 %v1522_v17, %v1518_v13  ;;  %v850_v17 = vadd.f32 %v849_v18, %v1606_v21 }
 0x121   : > { %v729_v12 = vadd.f32 %v1506_v6, %v693_v31 }
 0x122   : > { %v851_v45 = vadd.f32 %v850_v17, %v1609_v39 }
 0x123   : > { %v793_v9 = vmul.f32 0.01, %v729_v12  ;;  %vm761_vm2 = vcmp.gt.f32.partialorder %v729_v12, 0.0 }
 0x125   : > { %v1530_v23 = vpop.f32.mrf.mxu3  ;;  %v1632_v19 = vsel %vm761_vm2, %v729_v12, %v793_v9  ;;  %vm986_vm2 = vcmask 1040384  }
 0x126   : > { %v1538_v49 = vpop.f32.mrf.mxu2  ;;  %v1542_v32 = vpop.f32.mrf.mxu0 }
 0x127   : > { %v1548_v38 = vpop.f32.mrf.mxu1  ;;  %v694_v60 = vadd.f32 %v1538_v49, %v539_v63 }
 0x128   : > { %v541_v3 = vadd.f32 %v1548_v38, %v1542_v32 }
 0x129   : > { %v730_v32 = vadd.f32 %v1506_v6, %v694_v60 }
 0x12b   : > { %v794_v63 = vmul.f32 0.01, %v730_v32  ;;  %vm762_vm3 = vcmp.gt.f32.partialorder %v730_v32, 0.0 }
 0x12d   : > { %v1563_v30 = vpop.f32.mrf.mxu3  ;;  %v1636_v60 = vsel %vm762_vm3, %v730_v32, %v794_v63 }
 0x12e   : > { %v643_v15 = vpop.f32.mrf.mxu2  ;;  %v440_v20 = vpop.f32.mrf.mxu0 }
 0x12f   : > { %v543_v27 = vpop.f32.mrf.mxu1  ;;  %v695_v51 = vadd.f32 %v643_v15, %v541_v3 }
 0x130   : > { %v544_v13 = vadd.f32 %v543_v27, %v440_v20  ;;  %v852_v27 = vadd.f32 %v851_v45, %v1616_v52 }
 0x131   : > { %v731_v15 = vadd.f32 %v1506_v6, %v695_v51 }
 0x132   : > { %v853_v57 = vadd.f32 %v852_v27, %v1620_v46  ;;  %v702_v27 = vadd.f32 %v1530_v23, %v1455_v25 }
 0x133   : > { %v795_v18 = vmul.f32 0.01, %v731_v15  ;;  %vm763_vm4 = vcmp.gt.f32.partialorder %v731_v15, 0.0 }
 0x135   : > { %v1597_v58 = vpop.f32.mrf.mxu3  ;;  %v1642_v12 = vsel %vm763_vm4, %v731_v15, %v795_v18 }
 0x136   : > { %v646_v34 = vpop.f32.mrf.mxu2  ;;  %v442_v44 = vpop.f32.mrf.mxu0  ;;  %v704_v25 = vadd.f32 %v1597_v58, %v1463_v42 }
 0x137   : > { %v545_v11 = vpop.f32.mrf.mxu1  ;;  %v696_v38 = vadd.f32 %v646_v34, %v544_v13  ;;  %v700_v13 = vadd.f32 %v1495_v0, %v1446_v10 }
 0x138   : > { %v546_v20 = vadd.f32 %v545_v11, %v442_v44  ;;  %v854_v44 = vadd.f32 %v853_v57, %v1624_v41 }
 0x139   : > { %v732_v34 = vadd.f32 %v1506_v6, %v696_v38  ;;  %v736_v10 = vadd.f32 %v1506_v6, %v700_v13 }
 0x13a   : > { %v855_v1 = vadd.f32 %v854_v44, %v1628_v61  ;;  %v738_v44 = vadd.f32 %v1506_v6, %v702_v27 }
 0x13b   : > { %v796_v26 = vmul.f32 0.01, %v732_v34  ;;  %vm764_vm5 = vcmp.gt.f32.partialorder %v732_v34, 0.0  ;;  %v800_v63 = vmul.f32 0.01, %v736_v10  ;;  %vm768_vm9 = vcmp.gt.f32.partialorder %v736_v10, 0.0 }
 0x13c   : > { %v856_v17 = vadd.f32 %v855_v1, %v1632_v19  ;;  %v802_v58 = vmul.f32 0.01, %v738_v44  ;;  %vm770_vm11 = vcmp.gt.f32.partialorder %v738_v44, 0.0 }
 0x13d   : > { %v668_v5 = vpop.f32.mrf.mxu3  ;;  %v1647_v54 = vsel %vm764_vm5, %v732_v34, %v796_v26  ;;  %v1674_v42 = vsel %vm768_vm9, %v736_v10, %v800_v63  ;;  %v1287_v10 = vmov 256.0  }
 0x13e   : > { %v648_v48 = vpop.f32.mrf.mxu2  ;;  %v445_v35 = vpop.f32.mrf.mxu0  ;;  %v857_v45 = vadd.f32 %v856_v17, %v1636_v60  ;;  %1261 = vrcp.f32 %v1287_v10 }
 0x13f   : > { %v548_v49 = vpop.f32.mrf.mxu1  ;;  %v697_v47 = vadd.f32 %v648_v48, %v546_v20 }
 0x140   : > { %v549_v53 = vadd.f32 %v548_v49, %v445_v35  ;;  %v701_v49 = vadd.f32 %v1510_v8, %v1451_v16  ;;  %v858_v0 = vadd.f32 %v857_v45, %v1642_v12  ;;  %v703_v8 = vadd.f32 %v1563_v30, %v1459_v33 }
 0x141   : > { %v733_v29 = vadd.f32 %v1506_v6, %v697_v47  ;;  %v705_v30 = vadd.f32 %v668_v5, %v1471_v50 }
 0x142   : > { %v859_v47 = vadd.f32 %v858_v0, %v1647_v54  ;;  %v737_v16 = vadd.f32 %v1506_v6, %v701_v49  ;;  %v739_v33 = vadd.f32 %v1506_v6, %v703_v8 }
 0x143   : > { %v797_v51 = vmul.f32 0.01, %v733_v29  ;;  %vm765_vm6 = vcmp.gt.f32.partialorder %v733_v29, 0.0 }
 0x144   : > { %v801_v18 = vmul.f32 0.01, %v737_v16  ;;  %vm769_vm10 = vcmp.gt.f32.partialorder %v737_v16, 0.0  ;;  %v803_v5 = vmul.f32 0.01, %v739_v33  ;;  %vm771_vm12 = vcmp.gt.f32.partialorder %v739_v33, 0.0 }
 0x145   : > { %v671_v35 = vpop.f32.mrf.mxu3  ;;  %v1653_v9 = vsel %vm765_vm6, %v733_v29, %v797_v51 }
 0x146   : > { %v651_v11 = vpop.f32.mrf.mxu2  ;;  %v447_v36 = vpop.f32.mrf.mxu0  ;;  %v860_v34 = vadd.f32 %v859_v47, %v1653_v9  ;;  %v706_v13 = vadd.f32 %v671_v35, %v1479_v55  ;;  %v1679_v50 = vsel %vm769_vm10, %v737_v16, %v801_v18  ;;  %v1687_v35 = vsel %vm771_vm12, %v739_v33, %v803_v5 }
 0x147   : > { %v698_v31 = vadd.f32 %v651_v11, %v549_v53  ;;  %v550_v48 = vpop.f32.mrf.mxu1 }
 0x148   : > { %v551_v38 = vadd.f32 %v550_v48, %v447_v36  ;;  %v741_v36 = vadd.f32 %v1506_v6, %v705_v30  ;;  %v1683_v48 = vsel %vm770_vm11, %v738_v44, %v802_v58  ;;  %v742_v45 = vadd.f32 %v1506_v6, %v706_v13 }
 0x149   : > { %v734_v3 = vadd.f32 %v1506_v6, %v698_v31  ;;  %v571_v31 = vadd.f32 %v1487_v59, %v1441_v2 }
 0x14a   : > { %v805_v49 = vmul.f32 0.01, %v741_v36  ;;  %vm773_vm14 = vcmp.gt.f32.partialorder %v741_v36, 0.0  ;;  %vm774_vm15 = vcmp.gt.f32.partialorder %v742_v45, 0.0 }
 0x14b   : > { %v798_v32 = vmul.f32 0.01, %v734_v3  ;;  %vm766_vm7 = vcmp.gt.f32.partialorder %v734_v3, 0.0 }
 0x14d   : > { %v1659_v53 = vsel %vm766_vm7, %v734_v3, %v798_v32  ;;  %v673_v26 = vpop.f32.mrf.mxu3  ;;  %v740_v3 = vadd.f32 %v1506_v6, %v704_v25 }
 0x14e   : > { %v653_v20 = vpop.f32.mrf.mxu2  ;;  %v861_v11 = vadd.f32 %v860_v34, %v1659_v53  ;;  %v707_v2 = vadd.f32 %v673_v26, %v571_v31 }
 0x14f   : > { %v699_v15 = vadd.f32 %v653_v20, %v551_v38  ;;  %v804_v51 = vmul.f32 0.01, %v740_v3  ;;  %vm772_vm13 = vcmp.gt.f32.partialorder %v740_v3, 0.0  ;;  %v806_v20 = vmul.f32 0.01, %v742_v45 }
 0x150   : > { %v743_v32 = vadd.f32 %v1506_v6, %v707_v2 }
 0x151   : > { %v735_v57 = vadd.f32 %v1506_v6, %v699_v15  ;;  %v1691_v0 = vsel %vm772_vm13, %v740_v3, %v804_v51  ;;  %v1694_v15 = vsel %vm773_vm14, %v741_v36, %v805_v49  ;;  %v1697_v8 = vsel %vm774_vm15, %v742_v45, %v806_v20  ;;  %v1262_v6 = vpop.eup %1261 }
 0x152   : > { %v807_v47 = vmul.f32 0.01, %v743_v32  ;;  %vm775_vm0 = vcmp.gt.f32.partialorder %v743_v32, 0.0  ;;  %v878_v44 = vmul.f32 256.0, %v1262_v6  ;;  %vm882_vm1 = vweird.f32 %v1262_v6 }
 0x153   : > { %vm767_vm8 = vcmp.gt.f32.partialorder %v735_v57, 0.0  ;;  %v799_v23 = vmul.f32 0.01, %v735_v57 }
 0x154   : > { %v1700_v63 = vsel %vm775_vm0, %v743_v32, %v807_v47 }
 0x155   : > { %v1669_v29 = vsel %vm767_vm8, %v735_v57, %v799_v23 }
 0x156   : > { %v862_v1 = vadd.f32 %v861_v11, %v1669_v29  ;;  %v879_v11 = vsub.f32 1.0, %v878_v44 }
 0x158   : > { %v863_v17 = vadd.f32 %v862_v1, %v1674_v42  ;;  %v880_v30 = vmul.f32 %v1262_v6, %v879_v11 }
 0x15a   : > { %v864_v59 = vadd.f32 %v863_v17, %v1679_v50  ;;  %v881_v1 = vadd.f32 %v1262_v6, %v880_v30 }
 0x15c   : > { %v865_v55 = vadd.f32 %v864_v59, %v1683_v48  ;;  %v883_v58 = vsel %vm882_vm1, %v1262_v6, %v881_v1 }
 0x15e   : > { %v866_v38 = vadd.f32 %v865_v55, %v1687_v35 }
 0x160   : > { %v867_v27 = vadd.f32 %v866_v38, %v1691_v0 }
 0x162   : > { %v868_v16 = vadd.f32 %v867_v27, %v1694_v15 }
 0x164   : > { %v869_v57 = vadd.f32 %v868_v16, %v1697_v8 }
 0x166   : > { %v870_v34 = vadd.f32 %v869_v57, %v1700_v63 }
 0x168   : > { %v871_v25 = vrot.slane %v870_v34, 4 }
 0x16a   : > { %v872_v23 = vadd.f32 %v871_v25, %v870_v34 }
 0x16c   : > { %v873_v18 = vrot.slane %v872_v23, 2 }
 0x16e   : > { %v874_v33 = vadd.f32 %v873_v18, %v872_v23 }
 0x170   : > { %v875_v31 = vrot.slane %v874_v33, 1 }
 0x172   : > { %v876_v26 = vadd.f32 %v875_v31, %v874_v33 }
 0x174   : > { %v1703_v3 = vmul.f32 %v883_v58, %v876_v26 }
 0x176   : > { %v885_v13 = vsub.f32 %v1532_v43, %v1703_v3  ;;  %v886_v17 = vsub.f32 %v1526_v24, %v1703_v3  ;;  %v887_v5 = vsub.f32 %v1534_v22, %v1703_v3  ;;  %v888_v59 = vsub.f32 %v1544_v56, %v1703_v3 }
 0x177   : > { %v889_v51 = vsub.f32 %v1551_v62, %v1703_v3  ;;  %v890_v49 = vsub.f32 %v1558_v7, %v1703_v3  ;;  %v891_v24 = vsub.f32 %v1561_v4, %v1703_v3  ;;  %v892_v10 = vsub.f32 %v1566_v37, %v1703_v3 }
 0x178   : > { %v917_v36 = vmul.f32 %v885_v13, %v885_v13  ;;  %v918_v2 = vmul.f32 %v886_v17, %v886_v17  ;;  %v919_v45 = vmul.f32 %v887_v5, %v887_v5  ;;  %v920_v43 = vmul.f32 %v888_v59, %v888_v59 }
 0x179   : > { %v921_v38 = vmul.f32 %v889_v51, %v889_v51  ;;  %v922_v20 = vmul.f32 %v890_v49, %v890_v49  ;;  %v893_v62 = vsub.f32 %v1575_v28, %v1703_v3  ;;  %v923_v27 = vmul.f32 %v891_v24, %v891_v24 }
 0x17a   : > { %v949_v55 = vadd.f32 %v918_v2, %v917_v36  ;;  %v894_v7 = vsub.f32 %v1578_v40, %v1703_v3  ;;  %v924_v16 = vmul.f32 %v892_v10, %v892_v10  ;;  %v895_v4 = vsub.f32 %v1594_v14, %v1703_v3 }
 0x17b   : > { %v925_v57 = vmul.f32 %v893_v62, %v893_v62  ;;  %v896_v37 = vsub.f32 %v1606_v21, %v1703_v3  ;;  %v897_v28 = vsub.f32 %v1609_v39, %v1703_v3  ;;  %v898_v40 = vsub.f32 %v1616_v52, %v1703_v3 }
 0x17c   : > { %v950_v32 = vadd.f32 %v949_v55, %v919_v45  ;;  %v926_v44 = vmul.f32 %v894_v7, %v894_v7  ;;  %v927_v23 = vmul.f32 %v895_v4, %v895_v4  ;;  %v899_v14 = vsub.f32 %v1620_v46, %v1703_v3 }
 0x17d   : > { %v928_v18 = vmul.f32 %v896_v37, %v896_v37  ;;  %v929_v30 = vmul.f32 %v897_v28, %v897_v28  ;;  %v900_v21 = vsub.f32 %v1624_v41, %v1703_v3  ;;  %v930_v1 = vmul.f32 %v898_v40, %v898_v40 }
 0x17e   : > { %v951_v22 = vadd.f32 %v950_v32, %v920_v43  ;;  %v901_v39 = vsub.f32 %v1628_v61, %v1703_v3  ;;  %v931_v58 = vmul.f32 %v899_v14, %v899_v14  ;;  %v902_v52 = vsub.f32 %v1632_v19, %v1703_v3 }
 0x17f   : > { %v932_v17 = vmul.f32 %v900_v21, %v900_v21  ;;  %v903_v46 = vsub.f32 %v1636_v60, %v1703_v3  ;;  %v904_v41 = vsub.f32 %v1642_v12, %v1703_v3  ;;  %v905_v61 = vsub.f32 %v1647_v54, %v1703_v3 }
 0x180   : > { %v952_v56 = vadd.f32 %v951_v22, %v921_v38  ;;  %v933_v36 = vmul.f32 %v901_v39, %v901_v39  ;;  %v934_v59 = vmul.f32 %v902_v52, %v902_v52  ;;  %v906_v19 = vsub.f32 %v1653_v9, %v1703_v3 }
 0x181   : > { %v935_v45 = vmul.f32 %v903_v46, %v903_v46  ;;  %v936_v49 = vmul.f32 %v904_v41, %v904_v41  ;;  %v907_v60 = vsub.f32 %v1659_v53, %v1703_v3  ;;  %v937_v32 = vmul.f32 %v905_v61, %v905_v61 }
 0x182   : > { %v953_v47 = vadd.f32 %v952_v56, %v922_v20  ;;  %v908_v12 = vsub.f32 %v1669_v29, %v1703_v3  ;;  %v938_v38 = vmul.f32 %v906_v19, %v906_v19  ;;  %v909_v54 = vsub.f32 %v1674_v42, %v1703_v3 }
 0x183   : > { %v939_v10 = vmul.f32 %v907_v60, %v907_v60  ;;  %v910_v9 = vsub.f32 %v1679_v50, %v1703_v3  ;;  %v911_v53 = vsub.f32 %v1683_v48, %v1703_v3  ;;  %v912_v29 = vsub.f32 %v1687_v35, %v1703_v3 }
 0x184   : > { %v954_v6 = vadd.f32 %v953_v47, %v923_v27  ;;  %v940_v56 = vmul.f32 %v908_v12, %v908_v12  ;;  %v941_v27 = vmul.f32 %v909_v54, %v909_v54  ;;  %v913_v42 = vsub.f32 %v1691_v0, %v1703_v3 }
 0x185   : > { %v942_v7 = vmul.f32 %v910_v9, %v910_v9  ;;  %v914_v50 = vsub.f32 %v1694_v15, %v1703_v3  ;;  %v915_v48 = vsub.f32 %v1697_v8, %v1703_v3  ;;  %v916_v35 = vsub.f32 %v1700_v63, %v1703_v3 }
 0x186   : > { %v955_v34 = vadd.f32 %v954_v6, %v924_v16  ;;  %v943_v6 = vmul.f32 %v911_v53, %v911_v53  ;;  %v945_v37 = vmul.f32 %v913_v42, %v913_v42 }
 0x188   : > { %v956_v25 = vadd.f32 %v955_v34, %v925_v57  ;;  %v944_v57 = vmul.f32 %v912_v29, %v912_v29 }
 0x18a   : > { %v957_v11 = vadd.f32 %v956_v25, %v926_v44  ;;  %v946_v25 = vmul.f32 %v914_v50, %v914_v50 }
 0x18c   : > { %v958_v33 = vadd.f32 %v957_v11, %v927_v23  ;;  %v947_v23 = vmul.f32 %v915_v48, %v915_v48  ;;  %v948_v11 = vmul.f32 %v916_v35, %v916_v35 }
 0x18e   : > { %v959_v31 = vadd.f32 %v958_v33, %v928_v18 }
 0x190   : > { %v960_v26 = vadd.f32 %v959_v31, %v929_v30 }
 0x192   : > { %v961_v13 = vadd.f32 %v960_v26, %v930_v1 }
 0x194   : > { %v962_v5 = vadd.f32 %v961_v13, %v931_v58 }
 0x196   : > { %v963_v2 = vadd.f32 %v962_v5, %v932_v17 }
 0x198   : > { %v964_v51 = vadd.f32 %v963_v2, %v933_v36 }
 0x19a   : > { %v965_v55 = vadd.f32 %v964_v51, %v934_v59 }
 0x19c   : > { %v966_v43 = vadd.f32 %v965_v55, %v935_v45 }
 0x19e   : > { %v967_v24 = vadd.f32 %v966_v43, %v936_v49 }
 0x1a0   : > { %v968_v22 = vadd.f32 %v967_v24, %v937_v32 }
 0x1a2   : > { %v969_v20 = vadd.f32 %v968_v22, %v938_v38 }
 0x1a4   : > { %v970_v62 = vadd.f32 %v969_v20, %v939_v10 }
 0x1a6   : > { %v971_v47 = vadd.f32 %v970_v62, %v940_v56 }
 0x1a8   : > { %v972_v16 = vadd.f32 %v971_v47, %v941_v27 }
 0x1aa   : > { %v973_v4 = vadd.f32 %v972_v16, %v942_v7 }
 0x1ac   : > { %v974_v34 = vadd.f32 %v973_v4, %v943_v6 }
 0x1ae   : > { %v975_v44 = vadd.f32 %v974_v34, %v944_v57 }
 0x1b0   : > { %v976_v28 = vadd.f32 %v975_v44, %v945_v37 }
 0x1b2   : > { %v977_v0 = vadd.f32 %v976_v28, %v946_v25 }
 0x1b4   : > { %v978_v40 = vadd.f32 %v977_v0, %v947_v23 }
 0x1b6   : > { %v979_v18 = vadd.f32 %v978_v40, %v948_v11 }
 0x1b8   : > { %v980_v33 = vrot.slane %v979_v18, 4 }
 0x1ba   : > { %v981_v15 = vadd.f32 %v980_v33, %v979_v18 }
 0x1bc   : > { %v982_v14 = vrot.slane %v981_v15, 2 }
 0x1be   : > { %v983_v30 = vadd.f32 %v982_v14, %v981_v15 }
 0x1c0   : > { %v984_v31 = vrot.slane %v983_v30, 1 }
 0x1c2   : > { %v985_v8 = vadd.f32 %v984_v31, %v983_v30 }
 0x1c4   : > { %v987_v63 = vsel %vm986_vm2, %v1703_v3, %v985_v8 }
 0x1c5   : > { %988 = vst [vmem:[%s202_s4] sm:$0x3] %v987_v63 }
 0x1c6 PF: > { %s13_s14 = sadd.s32 1, %s1285_s14   ;;  %s1787_s12 = smov %s1281_s13 }
 0x1c7   : > { %p10_p5 = scmp.ge.s32.totalorder %s13_s14, 4   ;;  %s1788_s13 = smov %s1790_s15 }
 0x1c9   :  { %12 = sbr.rel (!%p10_p5) target bundleno = 2 (0x2), region = 62 }

</bundles_post_ra>
